<compile_context>
chip_gen: v6e
topology: v6e:2x2x1
jax: 0.10.0
libtpu: 0.0.40
codegen_flags: <defaults>
</compile_context>

<pallas_src>
import jax
import jax.numpy as jnp
from jax import lax
from jax.experimental import pallas as pl
from jax.experimental.pallas import tpu as pltpu

INPUT_SIZE = 78
HIDDEN = 10
OUT = 2

LANE = 128            # vreg lane width
SUB = 8               # vreg sublane count
IN_PAD = 128          # input feature dim padded 78 -> 128
GSLOT = 64            # lanes per gate slot
GW = 4 * GSLOT        # 256 packed gate lanes: [ i | g | f | o ]
OUT_PAD = LANE        # lane-dense output width (real logits in lanes 0..OUT-1)

# lane offset of each gate inside the packed GW lanes
GATE_OFF = {"i": 0, "g": 64, "f": 128, "o": 192}
# PyTorch nn.LSTM row-block order inside w_ih / w_hh / biases: [i; f; g; o]
TORCH_BLOCK = {"i": 0, "f": 1, "g": 2, "o": 3}
# 0.5 pre-scale folded into weights for sigmoid gates (tanh identity); 1.0 for g
GATE_PRESCALE = {"i": 0.5, "f": 0.5, "g": 1.0, "o": 0.5}


def lstm_kernel(x_ref, wih_ref, whh_ref, b_ref, scale_ref, offset_ref,
                wout_ref, bout_ref, out_ref):
    """One-shot LSTM: batched input projection + fully unrolled recurrence."""
    Bp = out_ref.shape[0]
    T = x_ref.shape[0] // Bp

    # ---- Input projection for ALL timesteps in one matmul (off the serial
    # chain): (T*Bp, 128) @ (128, 256) + combined (pre-scaled) bias.  Padded
    # gate lanes stay exactly 0 (padded weight columns / bias lanes are 0).
    pre = (jnp.dot(x_ref[...], wih_ref[...],
                   preferred_element_type=jnp.float32) + b_ref[...])

    # ---- Loop-invariant operands hoisted out of the recurrence.
    whh = whh_ref[...]            # (128, 256), stays resident / streams once
    scale = scale_ref[...]        # (1, 256): 0.5 on sigmoid lanes, 1.0 on g
    offset = offset_ref[...]      # (1, 256): 0.5 on sigmoid lanes, 0.0 on g

    h = jnp.zeros((Bp, LANE), jnp.float32)   # real state in lanes 0..HIDDEN-1
    c = jnp.zeros((Bp, LANE), jnp.float32)

    # ---- Serial recurrence, fully unrolled (T is tiny and static).
    # Per step: one N=256 MXU op, one EUP tanh over the packed gates, one
    # EUP tanh on c, a handful of VPU mul/add, and two XLU 64-lane rolls.
    for t in range(T):
        gates = pre[t * Bp:(t + 1) * Bp, :] + jnp.dot(
            h, whh, preferred_element_type=jnp.float32)
        # sigmoid(x) = 0.5*tanh(x/2)+0.5 (0.5 pre-scale already in weights);
        # g lanes get plain tanh via the per-lane scale/offset vectors.
        act = jnp.tanh(gates) * scale + offset          # (Bp, 256)
        act0 = act[:, :LANE]      # [ i | g ]  (128-lane block, free slice)
        act1 = act[:, LANE:]      # [ f | o ]
        g_al = pltpu.roll(act0, 64, 1)   # g -> lanes 0..63 (64-shift: dir-safe)
        o_al = pltpu.roll(act1, 64, 1)   # o -> lanes 0..63
        # Real data lives in lanes 0..HIDDEN-1; other lanes carry bounded
        # garbage that never feeds back (padded W_hh / W_out rows are zero).
        c = act1 * c + act0 * g_al       # f*c + i*g   (lanes 0..H-1 exact)
        h = o_al * jnp.tanh(c)           # o*tanh(c)

    # ---- Fused final Linear; lane-dense (Bp, 128) store, real logits in
    # lanes 0..OUT-1 (padded W_out rows / bias lanes are zero).
    out_ref[...] = (jnp.dot(h, wout_ref[...],
                            preferred_element_type=jnp.float32)
                    + bout_ref[...])


def _pack_params(params):
    """Lay the PyTorch LSTM/Linear weights out into lane-aligned padded tiles.

    INVARIANT (correctness): all padded lanes / rows of wih/whh/bias/wout/bout
    MUST be exactly zero, and the initial h0/c0 must be zero.  That keeps the
    real lanes 0..HIDDEN-1 of h/c exact while the padded lanes only ever carry
    bounded garbage that cannot feed back (padded W_hh / W_out rows are zero).
    """
    H, I = HIDDEN, INPUT_SIZE
    w_ih = params["w_ih"]                      # (4H, I), rows ordered [i; f; g; o]
    w_hh = params["w_hh"]                      # (4H, H)
    bias = params["b_ih"] + params["b_hh"]     # (4H,)

    wih_pad = jnp.zeros((IN_PAD, GW), jnp.float32)
    whh_pad = jnp.zeros((LANE, GW), jnp.float32)
    b_pad = jnp.zeros((1, GW), jnp.float32)
    scale = jnp.zeros((1, GW), jnp.float32)
    offset = jnp.zeros((1, GW), jnp.float32)

    for name, off in GATE_OFF.items():
        blk = TORCH_BLOCK[name]
        s = GATE_PRESCALE[name]
        rows = slice(blk * H, (blk + 1) * H)
        wih_pad = wih_pad.at[:I, off:off + H].set(s * w_ih[rows, :].T)
        whh_pad = whh_pad.at[:H, off:off + H].set(s * w_hh[rows, :].T)
        b_pad = b_pad.at[0, off:off + H].set(s * bias[rows])
        if name == "g":                       # plain tanh gate
            scale = scale.at[0, off:off + GSLOT].set(1.0)
            # offset stays 0.0 on g lanes
        else:                                 # sigmoid gates via tanh identity
            scale = scale.at[0, off:off + GSLOT].set(0.5)
            offset = offset.at[0, off:off + GSLOT].set(0.5)

    wout_pad = jnp.zeros((LANE, OUT_PAD), jnp.float32).at[:H, :OUT].set(
        params["w_out"].T)
    bout_pad = jnp.zeros((1, OUT_PAD), jnp.float32).at[0, :OUT].set(
        params["b_out"])
    return wih_pad, whh_pad, b_pad, scale, offset, wout_pad, bout_pad


def rnn_forward(x, params):
    """x: (B, T, INPUT_SIZE) float32 (batch_first, matches the PyTorch module)."""
    B, T, I = x.shape
    Bp = max(SUB, ((B + SUB - 1) // SUB) * SUB)   # pad batch to full sublanes

    # time-major, batch padded to 8 sublanes, features padded 78 -> 128,
    # flattened to a lane-dense (T*Bp, 128) slab (no in-kernel reshape).
    x_tm = jnp.transpose(x, (1, 0, 2))            # (T, B, I)
    x_pad = jnp.zeros((T, Bp, IN_PAD), jnp.float32).at[:, :B, :I].set(x_tm)
    x_flat = x_pad.reshape(T * Bp, IN_PAD)

    wih_pad, whh_pad, b_pad, scale, offset, wout_pad, bout_pad = \
        _pack_params(params)

    # Cost estimate based on the padded shapes actually moved / computed.
    cost = pl.CostEstimate(
        flops=(2 * T * Bp * IN_PAD * GW          # input projection
               + 2 * T * Bp * LANE * GW          # recurrent matmuls
               + 2 * Bp * LANE * OUT_PAD),       # output projection
        transcendentals=T * Bp * (GW + LANE),    # tanh(gates) + tanh(c)
        bytes_accessed=4 * (T * Bp * IN_PAD
                            + IN_PAD * GW
                            + LANE * GW
                            + 3 * GW
                            + LANE * OUT_PAD + OUT_PAD
                            + Bp * OUT_PAD),
    )

    out_pad = pl.pallas_call(
        lstm_kernel,
        out_shape=jax.ShapeDtypeStruct((Bp, OUT_PAD), jnp.float32),
        grid_spec=pltpu.PrefetchScalarGridSpec(
            num_scalar_prefetch=0,
            grid=(1,),
            in_specs=[
                pl.BlockSpec((T * Bp, IN_PAD), lambda i: (0, 0)),   # x slab
                pl.BlockSpec((IN_PAD, GW), lambda i: (0, 0)),       # W_ih^T packed
                pl.BlockSpec((LANE, GW), lambda i: (0, 0)),         # W_hh^T packed
                pl.BlockSpec((1, GW), lambda i: (0, 0)),            # combined bias
                pl.BlockSpec((1, GW), lambda i: (0, 0)),            # post-scale
                pl.BlockSpec((1, GW), lambda i: (0, 0)),            # post-offset
                pl.BlockSpec((LANE, OUT_PAD), lambda i: (0, 0)),    # W_out^T packed
                pl.BlockSpec((1, OUT_PAD), lambda i: (0, 0)),       # b_out packed
            ],
            out_specs=pl.BlockSpec((Bp, OUT_PAD), lambda i: (0, 0)),
        ),
        compiler_params=pltpu.CompilerParams(
            dimension_semantics=("arbitrary",)),
        cost_estimate=cost,
    )(x_flat, wih_pad, whh_pad, b_pad, scale, offset, wout_pad, bout_pad)

    return out_pad[:B, :OUT]


def rnn_reference(x, params):
    """Pure-JAX reference replicating torch.nn.LSTM + Linear semantics."""
    B, T, I = x.shape

    def step(carry, x_t):
        h, c = carry
        gates = (x_t @ params["w_ih"].T + params["b_ih"]
                 + h @ params["w_hh"].T + params["b_hh"])
        i, f, g, o = jnp.split(gates, 4, axis=-1)
        i, f, o = jax.nn.sigmoid(i), jax.nn.sigmoid(f), jax.nn.sigmoid(o)
        g = jnp.tanh(g)
        c = f * c + i * g
        h = o * jnp.tanh(c)
        return (h, c), h

    h0 = jnp.zeros((B, HIDDEN), jnp.float32)
    c0 = jnp.zeros((B, HIDDEN), jnp.float32)
    (h_T, _), _ = lax.scan(step, (h0, c0), jnp.transpose(x, (1, 0, 2)))
    return h_T @ params["w_out"].T + params["b_out"]


def init_params(key):
    """Deterministic init mimicking PyTorch's U(-1/sqrt(H), 1/sqrt(H))."""
    ks = jax.random.split(key, 6)
    bound = 1.0 / jnp.sqrt(jnp.float32(HIDDEN))

    def u(k, shape):
        return jax.random.uniform(k, shape, jnp.float32, -bound, bound)

    return {
        "w_ih": u(ks[0], (4 * HIDDEN, INPUT_SIZE)),
        "w_hh": u(ks[1], (4 * HIDDEN, HIDDEN)),
        "b_ih": u(ks[2], (4 * HIDDEN,)),
        "b_hh": u(ks[3], (4 * HIDDEN,)),
        "w_out": u(ks[4], (OUT, HIDDEN)),
        "b_out": u(ks[5], (OUT,)),
    }


if __name__ == "__main__":
    key = jax.random.PRNGKey(0)
    k_param, k_x = jax.random.split(key)

    B, T = 2, 8
    x = jax.random.normal(k_x, (B, T, INPUT_SIZE), jnp.float32)
    params = init_params(k_param)

    out = rnn_forward(x, params)
    out = jax.block_until_ready(out)

    ref = rnn_reference(x, params)
    assert out.shape == (B, OUT)
    # tanh-identity sigmoid + hw transcendentals => tiny (~1e-6) deviations
    # from the pure-JAX reference; tolerance loosened accordingly.
    assert jnp.allclose(out, ref, atol=1e-4, rtol=1e-4), (out, ref)

    print("KERNEL_OK")
</pallas_src>

<mosaic_0001>
module attributes {stable_mosaic.version = 11 : i64} {
  func.func @lstm_kernel(%arg0: i32, %arg1: memref<64x128xf32, #tpu.memory_space<vmem>>, %arg2: memref<128x256xf32, #tpu.memory_space<vmem>>, %arg3: memref<128x256xf32, #tpu.memory_space<vmem>>, %arg4: memref<1x256xf32, #tpu.memory_space<vmem>>, %arg5: memref<1x256xf32, #tpu.memory_space<vmem>>, %arg6: memref<1x256xf32, #tpu.memory_space<vmem>>, %arg7: memref<128x128xf32, #tpu.memory_space<vmem>>, %arg8: memref<1x128xf32, #tpu.memory_space<vmem>>, %arg9: memref<8x128xf32, #tpu.memory_space<vmem>>) attributes {dimension_semantics = [#tpu.dimension_semantics<arbitrary>], iteration_bounds = array<i64: 1>, scalar_prefetch = 0 : i64, scratch_operands = 0 : i64, tpu.core_type = #tpu.core_type<tc>, window_params = [{pipeline_mode = #tpu.pipeline_mode<synchronous>, transform_indices = @transform_0, window_bounds = array<i64: 64, 128>}, {pipeline_mode = #tpu.pipeline_mode<synchronous>, transform_indices = @transform_1, window_bounds = array<i64: 128, 256>}, {pipeline_mode = #tpu.pipeline_mode<synchronous>, transform_indices = @transform_2, window_bounds = array<i64: 128, 256>}, {pipeline_mode = #tpu.pipeline_mode<synchronous>, transform_indices = @transform_3, window_bounds = array<i64: 1, 256>}, {pipeline_mode = #tpu.pipeline_mode<synchronous>, transform_indices = @transform_4, window_bounds = array<i64: 1, 256>}, {pipeline_mode = #tpu.pipeline_mode<synchronous>, transform_indices = @transform_5, window_bounds = array<i64: 1, 256>}, {pipeline_mode = #tpu.pipeline_mode<synchronous>, transform_indices = @transform_6, window_bounds = array<i64: 128, 128>}, {pipeline_mode = #tpu.pipeline_mode<synchronous>, transform_indices = @transform_7, window_bounds = array<i64: 1, 128>}, {pipeline_mode = #tpu.pipeline_mode<synchronous>, transform_indices = @transform_8, window_bounds = array<i64: 8, 128>}]} {
    %c0 = arith.constant 0 : index
    %c0_0 = arith.constant 0 : index
    %0 = vector.load %arg1[%c0, %c0_0] : memref<64x128xf32, #tpu.memory_space<vmem>>, vector<64x128xf32>
    %c0_1 = arith.constant 0 : index
    %c0_2 = arith.constant 0 : index
    %1 = vector.load %arg2[%c0_1, %c0_2] : memref<128x256xf32, #tpu.memory_space<vmem>>, vector<128x256xf32>
    %cst = arith.constant dense<0.000000e+00> : vector<64x256xf32>
    %2 = tpu.matmul %0, %1, %cst {dimension_numbers = #tpu.dot_dimension_numbers<[1], [0], [0], [1], [0, 0, 1, 1], [], []>} : vector<64x128xf32>, vector<128x256xf32>, vector<64x256xf32> -> vector<64x256xf32>
    %c0_3 = arith.constant 0 : index
    %c0_4 = arith.constant 0 : index
    %3 = vector.load %arg4[%c0_3, %c0_4] : memref<1x256xf32, #tpu.memory_space<vmem>>, vector<1x256xf32>
    %4 = vector.broadcast %3 : vector<1x256xf32> to vector<64x256xf32>
    %5 = arith.addf %2, %4 : vector<64x256xf32>
    %c0_5 = arith.constant 0 : index
    %c0_6 = arith.constant 0 : index
    %6 = vector.load %arg3[%c0_5, %c0_6] : memref<128x256xf32, #tpu.memory_space<vmem>>, vector<128x256xf32>
    %c0_7 = arith.constant 0 : index
    %c0_8 = arith.constant 0 : index
    %7 = vector.load %arg5[%c0_7, %c0_8] : memref<1x256xf32, #tpu.memory_space<vmem>>, vector<1x256xf32>
    %c0_9 = arith.constant 0 : index
    %c0_10 = arith.constant 0 : index
    %8 = vector.load %arg6[%c0_9, %c0_10] : memref<1x256xf32, #tpu.memory_space<vmem>>, vector<1x256xf32>
    %cst_11 = arith.constant 0.000000e+00 : f32
    %9 = vector.broadcast %cst_11 : f32 to vector<8x128xf32>
    %cst_12 = arith.constant 0.000000e+00 : f32
    %10 = vector.broadcast %cst_12 : f32 to vector<8x128xf32>
    %11 = vector.extract_strided_slice %5 {offsets = [0, 0], sizes = [8, 256], strides = [1, 1]} : vector<64x256xf32> to vector<8x256xf32>
    %cst_13 = arith.constant dense<0.000000e+00> : vector<8x256xf32>
    %12 = tpu.matmul %9, %6, %cst_13 {dimension_numbers = #tpu.dot_dimension_numbers<[1], [0], [0], [1], [0, 0, 1, 1], [], []>} : vector<8x128xf32>, vector<128x256xf32>, vector<8x256xf32> -> vector<8x256xf32>
    %13 = arith.addf %11, %12 : vector<8x256xf32>
    %14 = math.tanh %13 : vector<8x256xf32>
    %15 = vector.broadcast %7 : vector<1x256xf32> to vector<8x256xf32>
    %16 = arith.mulf %14, %15 : vector<8x256xf32>
    %17 = vector.broadcast %8 : vector<1x256xf32> to vector<8x256xf32>
    %18 = arith.addf %16, %17 : vector<8x256xf32>
    %19 = vector.extract_strided_slice %18 {offsets = [0, 0], sizes = [8, 128], strides = [1, 1]} : vector<8x256xf32> to vector<8x128xf32>
    %20 = vector.extract_strided_slice %18 {offsets = [0, 128], sizes = [8, 128], strides = [1, 1]} : vector<8x256xf32> to vector<8x128xf32>
    %c64_i32 = arith.constant 64 : i32
    %21 = tpu.dynamic_rotate %19 by %c64_i32 dim 1 : vector<8x128xf32>, i32 -> vector<8x128xf32>
    %c64_i32_14 = arith.constant 64 : i32
    %22 = tpu.dynamic_rotate %20 by %c64_i32_14 dim 1 : vector<8x128xf32>, i32 -> vector<8x128xf32>
    %23 = arith.mulf %20, %10 : vector<8x128xf32>
    %24 = arith.mulf %19, %21 : vector<8x128xf32>
    %25 = arith.addf %23, %24 : vector<8x128xf32>
    %26 = math.tanh %25 : vector<8x128xf32>
    %27 = arith.mulf %22, %26 : vector<8x128xf32>
    %28 = vector.extract_strided_slice %5 {offsets = [8, 0], sizes = [8, 256], strides = [1, 1]} : vector<64x256xf32> to vector<8x256xf32>
    %cst_15 = arith.constant dense<0.000000e+00> : vector<8x256xf32>
    %29 = tpu.matmul %27, %6, %cst_15 {dimension_numbers = #tpu.dot_dimension_numbers<[1], [0], [0], [1], [0, 0, 1, 1], [], []>} : vector<8x128xf32>, vector<128x256xf32>, vector<8x256xf32> -> vector<8x256xf32>
    %30 = arith.addf %28, %29 : vector<8x256xf32>
    %31 = math.tanh %30 : vector<8x256xf32>
    %32 = vector.broadcast %7 : vector<1x256xf32> to vector<8x256xf32>
    %33 = arith.mulf %31, %32 : vector<8x256xf32>
    %34 = vector.broadcast %8 : vector<1x256xf32> to vector<8x256xf32>
    %35 = arith.addf %33, %34 : vector<8x256xf32>
    %36 = vector.extract_strided_slice %35 {offsets = [0, 0], sizes = [8, 128], strides = [1, 1]} : vector<8x256xf32> to vector<8x128xf32>
    %37 = vector.extract_strided_slice %35 {offsets = [0, 128], sizes = [8, 128], strides = [1, 1]} : vector<8x256xf32> to vector<8x128xf32>
    %c64_i32_16 = arith.constant 64 : i32
    %38 = tpu.dynamic_rotate %36 by %c64_i32_16 dim 1 : vector<8x128xf32>, i32 -> vector<8x128xf32>
    %c64_i32_17 = arith.constant 64 : i32
    %39 = tpu.dynamic_rotate %37 by %c64_i32_17 dim 1 : vector<8x128xf32>, i32 -> vector<8x128xf32>
    %40 = arith.mulf %37, %25 : vector<8x128xf32>
    %41 = arith.mulf %36, %38 : vector<8x128xf32>
    %42 = arith.addf %40, %41 : vector<8x128xf32>
    %43 = math.tanh %42 : vector<8x128xf32>
    %44 = arith.mulf %39, %43 : vector<8x128xf32>
    %45 = vector.extract_strided_slice %5 {offsets = [16, 0], sizes = [8, 256], strides = [1, 1]} : vector<64x256xf32> to vector<8x256xf32>
    %cst_18 = arith.constant dense<0.000000e+00> : vector<8x256xf32>
    %46 = tpu.matmul %44, %6, %cst_18 {dimension_numbers = #tpu.dot_dimension_numbers<[1], [0], [0], [1], [0, 0, 1, 1], [], []>} : vector<8x128xf32>, vector<128x256xf32>, vector<8x256xf32> -> vector<8x256xf32>
    %47 = arith.addf %45, %46 : vector<8x256xf32>
    %48 = math.tanh %47 : vector<8x256xf32>
    %49 = vector.broadcast %7 : vector<1x256xf32> to vector<8x256xf32>
    %50 = arith.mulf %48, %49 : vector<8x256xf32>
    %51 = vector.broadcast %8 : vector<1x256xf32> to vector<8x256xf32>
    %52 = arith.addf %50, %51 : vector<8x256xf32>
    %53 = vector.extract_strided_slice %52 {offsets = [0, 0], sizes = [8, 128], strides = [1, 1]} : vector<8x256xf32> to vector<8x128xf32>
    %54 = vector.extract_strided_slice %52 {offsets = [0, 128], sizes = [8, 128], strides = [1, 1]} : vector<8x256xf32> to vector<8x128xf32>
    %c64_i32_19 = arith.constant 64 : i32
    %55 = tpu.dynamic_rotate %53 by %c64_i32_19 dim 1 : vector<8x128xf32>, i32 -> vector<8x128xf32>
    %c64_i32_20 = arith.constant 64 : i32
    %56 = tpu.dynamic_rotate %54 by %c64_i32_20 dim 1 : vector<8x128xf32>, i32 -> vector<8x128xf32>
    %57 = arith.mulf %54, %42 : vector<8x128xf32>
    %58 = arith.mulf %53, %55 : vector<8x128xf32>
    %59 = arith.addf %57, %58 : vector<8x128xf32>
    %60 = math.tanh %59 : vector<8x128xf32>
    %61 = arith.mulf %56, %60 : vector<8x128xf32>
    %62 = vector.extract_strided_slice %5 {offsets = [24, 0], sizes = [8, 256], strides = [1, 1]} : vector<64x256xf32> to vector<8x256xf32>
    %cst_21 = arith.constant dense<0.000000e+00> : vector<8x256xf32>
    %63 = tpu.matmul %61, %6, %cst_21 {dimension_numbers = #tpu.dot_dimension_numbers<[1], [0], [0], [1], [0, 0, 1, 1], [], []>} : vector<8x128xf32>, vector<128x256xf32>, vector<8x256xf32> -> vector<8x256xf32>
    %64 = arith.addf %62, %63 : vector<8x256xf32>
    %65 = math.tanh %64 : vector<8x256xf32>
    %66 = vector.broadcast %7 : vector<1x256xf32> to vector<8x256xf32>
    %67 = arith.mulf %65, %66 : vector<8x256xf32>
    %68 = vector.broadcast %8 : vector<1x256xf32> to vector<8x256xf32>
    %69 = arith.addf %67, %68 : vector<8x256xf32>
    %70 = vector.extract_strided_slice %69 {offsets = [0, 0], sizes = [8, 128], strides = [1, 1]} : vector<8x256xf32> to vector<8x128xf32>
    %71 = vector.extract_strided_slice %69 {offsets = [0, 128], sizes = [8, 128], strides = [1, 1]} : vector<8x256xf32> to vector<8x128xf32>
    %c64_i32_22 = arith.constant 64 : i32
    %72 = tpu.dynamic_rotate %70 by %c64_i32_22 dim 1 : vector<8x128xf32>, i32 -> vector<8x128xf32>
    %c64_i32_23 = arith.constant 64 : i32
    %73 = tpu.dynamic_rotate %71 by %c64_i32_23 dim 1 : vector<8x128xf32>, i32 -> vector<8x128xf32>
    %74 = arith.mulf %71, %59 : vector<8x128xf32>
    %75 = arith.mulf %70, %72 : vector<8x128xf32>
    %76 = arith.addf %74, %75 : vector<8x128xf32>
    %77 = math.tanh %76 : vector<8x128xf32>
    %78 = arith.mulf %73, %77 : vector<8x128xf32>
    %79 = vector.extract_strided_slice %5 {offsets = [32, 0], sizes = [8, 256], strides = [1, 1]} : vector<64x256xf32> to vector<8x256xf32>
    %cst_24 = arith.constant dense<0.000000e+00> : vector<8x256xf32>
    %80 = tpu.matmul %78, %6, %cst_24 {dimension_numbers = #tpu.dot_dimension_numbers<[1], [0], [0], [1], [0, 0, 1, 1], [], []>} : vector<8x128xf32>, vector<128x256xf32>, vector<8x256xf32> -> vector<8x256xf32>
    %81 = arith.addf %79, %80 : vector<8x256xf32>
    %82 = math.tanh %81 : vector<8x256xf32>
    %83 = vector.broadcast %7 : vector<1x256xf32> to vector<8x256xf32>
    %84 = arith.mulf %82, %83 : vector<8x256xf32>
    %85 = vector.broadcast %8 : vector<1x256xf32> to vector<8x256xf32>
    %86 = arith.addf %84, %85 : vector<8x256xf32>
    %87 = vector.extract_strided_slice %86 {offsets = [0, 0], sizes = [8, 128], strides = [1, 1]} : vector<8x256xf32> to vector<8x128xf32>
    %88 = vector.extract_strided_slice %86 {offsets = [0, 128], sizes = [8, 128], strides = [1, 1]} : vector<8x256xf32> to vector<8x128xf32>
    %c64_i32_25 = arith.constant 64 : i32
    %89 = tpu.dynamic_rotate %87 by %c64_i32_25 dim 1 : vector<8x128xf32>, i32 -> vector<8x128xf32>
    %c64_i32_26 = arith.constant 64 : i32
    %90 = tpu.dynamic_rotate %88 by %c64_i32_26 dim 1 : vector<8x128xf32>, i32 -> vector<8x128xf32>
    %91 = arith.mulf %88, %76 : vector<8x128xf32>
    %92 = arith.mulf %87, %89 : vector<8x128xf32>
    %93 = arith.addf %91, %92 : vector<8x128xf32>
    %94 = math.tanh %93 : vector<8x128xf32>
    %95 = arith.mulf %90, %94 : vector<8x128xf32>
    %96 = vector.extract_strided_slice %5 {offsets = [40, 0], sizes = [8, 256], strides = [1, 1]} : vector<64x256xf32> to vector<8x256xf32>
    %cst_27 = arith.constant dense<0.000000e+00> : vector<8x256xf32>
    %97 = tpu.matmul %95, %6, %cst_27 {dimension_numbers = #tpu.dot_dimension_numbers<[1], [0], [0], [1], [0, 0, 1, 1], [], []>} : vector<8x128xf32>, vector<128x256xf32>, vector<8x256xf32> -> vector<8x256xf32>
    %98 = arith.addf %96, %97 : vector<8x256xf32>
    %99 = math.tanh %98 : vector<8x256xf32>
    %100 = vector.broadcast %7 : vector<1x256xf32> to vector<8x256xf32>
    %101 = arith.mulf %99, %100 : vector<8x256xf32>
    %102 = vector.broadcast %8 : vector<1x256xf32> to vector<8x256xf32>
    %103 = arith.addf %101, %102 : vector<8x256xf32>
    %104 = vector.extract_strided_slice %103 {offsets = [0, 0], sizes = [8, 128], strides = [1, 1]} : vector<8x256xf32> to vector<8x128xf32>
    %105 = vector.extract_strided_slice %103 {offsets = [0, 128], sizes = [8, 128], strides = [1, 1]} : vector<8x256xf32> to vector<8x128xf32>
    %c64_i32_28 = arith.constant 64 : i32
    %106 = tpu.dynamic_rotate %104 by %c64_i32_28 dim 1 : vector<8x128xf32>, i32 -> vector<8x128xf32>
    %c64_i32_29 = arith.constant 64 : i32
    %107 = tpu.dynamic_rotate %105 by %c64_i32_29 dim 1 : vector<8x128xf32>, i32 -> vector<8x128xf32>
    %108 = arith.mulf %105, %93 : vector<8x128xf32>
    %109 = arith.mulf %104, %106 : vector<8x128xf32>
    %110 = arith.addf %108, %109 : vector<8x128xf32>
    %111 = math.tanh %110 : vector<8x128xf32>
    %112 = arith.mulf %107, %111 : vector<8x128xf32>
    %113 = vector.extract_strided_slice %5 {offsets = [48, 0], sizes = [8, 256], strides = [1, 1]} : vector<64x256xf32> to vector<8x256xf32>
    %cst_30 = arith.constant dense<0.000000e+00> : vector<8x256xf32>
    %114 = tpu.matmul %112, %6, %cst_30 {dimension_numbers = #tpu.dot_dimension_numbers<[1], [0], [0], [1], [0, 0, 1, 1], [], []>} : vector<8x128xf32>, vector<128x256xf32>, vector<8x256xf32> -> vector<8x256xf32>
    %115 = arith.addf %113, %114 : vector<8x256xf32>
    %116 = math.tanh %115 : vector<8x256xf32>
    %117 = vector.broadcast %7 : vector<1x256xf32> to vector<8x256xf32>
    %118 = arith.mulf %116, %117 : vector<8x256xf32>
    %119 = vector.broadcast %8 : vector<1x256xf32> to vector<8x256xf32>
    %120 = arith.addf %118, %119 : vector<8x256xf32>
    %121 = vector.extract_strided_slice %120 {offsets = [0, 0], sizes = [8, 128], strides = [1, 1]} : vector<8x256xf32> to vector<8x128xf32>
    %122 = vector.extract_strided_slice %120 {offsets = [0, 128], sizes = [8, 128], strides = [1, 1]} : vector<8x256xf32> to vector<8x128xf32>
    %c64_i32_31 = arith.constant 64 : i32
    %123 = tpu.dynamic_rotate %121 by %c64_i32_31 dim 1 : vector<8x128xf32>, i32 -> vector<8x128xf32>
    %c64_i32_32 = arith.constant 64 : i32
    %124 = tpu.dynamic_rotate %122 by %c64_i32_32 dim 1 : vector<8x128xf32>, i32 -> vector<8x128xf32>
    %125 = arith.mulf %122, %110 : vector<8x128xf32>
    %126 = arith.mulf %121, %123 : vector<8x128xf32>
    %127 = arith.addf %125, %126 : vector<8x128xf32>
    %128 = math.tanh %127 : vector<8x128xf32>
    %129 = arith.mulf %124, %128 : vector<8x128xf32>
    %130 = vector.extract_strided_slice %5 {offsets = [56, 0], sizes = [8, 256], strides = [1, 1]} : vector<64x256xf32> to vector<8x256xf32>
    %cst_33 = arith.constant dense<0.000000e+00> : vector<8x256xf32>
    %131 = tpu.matmul %129, %6, %cst_33 {dimension_numbers = #tpu.dot_dimension_numbers<[1], [0], [0], [1], [0, 0, 1, 1], [], []>} : vector<8x128xf32>, vector<128x256xf32>, vector<8x256xf32> -> vector<8x256xf32>
    %132 = arith.addf %130, %131 : vector<8x256xf32>
    %133 = math.tanh %132 : vector<8x256xf32>
    %134 = vector.broadcast %7 : vector<1x256xf32> to vector<8x256xf32>
    %135 = arith.mulf %133, %134 : vector<8x256xf32>
    %136 = vector.broadcast %8 : vector<1x256xf32> to vector<8x256xf32>
    %137 = arith.addf %135, %136 : vector<8x256xf32>
    %138 = vector.extract_strided_slice %137 {offsets = [0, 0], sizes = [8, 128], strides = [1, 1]} : vector<8x256xf32> to vector<8x128xf32>
    %139 = vector.extract_strided_slice %137 {offsets = [0, 128], sizes = [8, 128], strides = [1, 1]} : vector<8x256xf32> to vector<8x128xf32>
    %c64_i32_34 = arith.constant 64 : i32
    %140 = tpu.dynamic_rotate %138 by %c64_i32_34 dim 1 : vector<8x128xf32>, i32 -> vector<8x128xf32>
    %c64_i32_35 = arith.constant 64 : i32
    %141 = tpu.dynamic_rotate %139 by %c64_i32_35 dim 1 : vector<8x128xf32>, i32 -> vector<8x128xf32>
    %142 = arith.mulf %139, %127 : vector<8x128xf32>
    %143 = arith.mulf %138, %140 : vector<8x128xf32>
    %144 = arith.addf %142, %143 : vector<8x128xf32>
    %145 = math.tanh %144 : vector<8x128xf32>
    %146 = arith.mulf %141, %145 : vector<8x128xf32>
    %c0_36 = arith.constant 0 : index
    %c0_37 = arith.constant 0 : index
    %147 = vector.load %arg7[%c0_36, %c0_37] : memref<128x128xf32, #tpu.memory_space<vmem>>, vector<128x128xf32>
    %cst_38 = arith.constant dense<0.000000e+00> : vector<8x128xf32>
    %148 = tpu.matmul %146, %147, %cst_38 {dimension_numbers = #tpu.dot_dimension_numbers<[1], [0], [0], [1], [0, 0, 1, 1], [], []>} : vector<8x128xf32>, vector<128x128xf32>, vector<8x128xf32> -> vector<8x128xf32>
    %c0_39 = arith.constant 0 : index
    %c0_40 = arith.constant 0 : index
    %149 = vector.load %arg8[%c0_39, %c0_40] : memref<1x128xf32, #tpu.memory_space<vmem>>, vector<1x128xf32>
    %150 = vector.broadcast %149 : vector<1x128xf32> to vector<8x128xf32>
    %151 = arith.addf %148, %150 : vector<8x128xf32>
    %c0_41 = arith.constant 0 : index
    %c0_42 = arith.constant 0 : index
    %152 = vector.load %arg9[%c0_41, %c0_42] : memref<8x128xf32, #tpu.memory_space<vmem>>, vector<8x128xf32>
    tpu.vector_store %arg9[%c0_41, %c0_42], %151 {strides = array<i32>} : memref<8x128xf32, #tpu.memory_space<vmem>>, vector<8x128xf32>,
    return
  }
  func.func @transform_0(%arg0: i32) -> (i32, i32) {
    %c0_i32 = arith.constant 0 : i32
    %c0_i32_0 = arith.constant 0 : i32
    %c0_i32_1 = arith.constant 0 : i32
    return %c0_i32, %c0_i32_0 : i32, i32
  }
  func.func @transform_1(%arg0: i32) -> (i32, i32) {
    %c0_i32 = arith.constant 0 : i32
    %c0_i32_0 = arith.constant 0 : i32
    %c0_i32_1 = arith.constant 0 : i32
    return %c0_i32, %c0_i32_0 : i32, i32
  }
  func.func @transform_2(%arg0: i32) -> (i32, i32) {
    %c0_i32 = arith.constant 0 : i32
    %c0_i32_0 = arith.constant 0 : i32
    %c0_i32_1 = arith.constant 0 : i32
    return %c0_i32, %c0_i32_0 : i32, i32
  }
  func.func @transform_3(%arg0: i32) -> (i32, i32) {
    %c0_i32 = arith.constant 0 : i32
    %c0_i32_0 = arith.constant 0 : i32
    %c0_i32_1 = arith.constant 0 : i32
    return %c0_i32, %c0_i32_0 : i32, i32
  }
  func.func @transform_4(%arg0: i32) -> (i32, i32) {
    %c0_i32 = arith.constant 0 : i32
    %c0_i32_0 = arith.constant 0 : i32
    %c0_i32_1 = arith.constant 0 : i32
    return %c0_i32, %c0_i32_0 : i32, i32
  }
  func.func @transform_5(%arg0: i32) -> (i32, i32) {
    %c0_i32 = arith.constant 0 : i32
    %c0_i32_0 = arith.constant 0 : i32
    %c0_i32_1 = arith.constant 0 : i32
    return %c0_i32, %c0_i32_0 : i32, i32
  }
  func.func @transform_6(%arg0: i32) -> (i32, i32) {
    %c0_i32 = arith.constant 0 : i32
    %c0_i32_0 = arith.constant 0 : i32
    %c0_i32_1 = arith.constant 0 : i32
    return %c0_i32, %c0_i32_0 : i32, i32
  }
  func.func @transform_7(%arg0: i32) -> (i32, i32) {
    %c0_i32 = arith.constant 0 : i32
    %c0_i32_0 = arith.constant 0 : i32
    %c0_i32_1 = arith.constant 0 : i32
    return %c0_i32, %c0_i32_0 : i32, i32
  }
  func.func @transform_8(%arg0: i32) -> (i32, i32) {
    %c0_i32 = arith.constant 0 : i32
    %c0_i32_0 = arith.constant 0 : i32
    %c0_i32_1 = arith.constant 0 : i32
    return %c0_i32, %c0_i32_0 : i32, i32
  }
}

</mosaic_0001>

<bundles_post_ra>
// kernel: tpu_custom_call.1
= control target key start
LH: loop header
LB: loop body
LE: loop exit
PB: predicated region body
PF: predicated region fallthrough
CT: control target
= control target key end

     0   :  { %13 = vsyncpa [#allocation3], 0  ;;  %s1906_s0 = inlined_call_operand.hbm [shape: f32[64,128], index: 0, kind: input, shape index: {}]   ;;  %s1907_s1 = inlined_call_operand.hbm [shape: f32[128,256], index: 1, kind: input, shape index: {}]   ;;  %s1908_s2 = inlined_call_operand.hbm [shape: f32[128,256], index: 2, kind: input, shape index: {}]   ;;  %s1909_s3 = inlined_call_operand.vmem [shape: f32[1,256], index: 3, kind: input, shape index: {}]   ;;  %s1910_s4 = inlined_call_operand.vmem [shape: f32[1,256], index: 4, kind: input, shape index: {}]   ;;  %s1911_s5 = inlined_call_operand.vmem [shape: f32[1,256], index: 5, kind: input, shape index: {}]   ;;  %s1912_s6 = inlined_call_operand.hbm [shape: f32[128,128], index: 6, kind: input, shape index: {}]   ;;  %s1913_s7 = inlined_call_operand.vmem [shape: f32[1,128], index: 7, kind: input, shape index: {}]   ;;  %s1914_s8 = inlined_call_operand.hbm [shape: f32[8,128], index: 8, kind: output, shape index: {}]  }
   0x1   :  { %14 = vsyncpa [#allocation6], 0 }
   0x2   :  { %15 = vsyncpa [#allocation9], 0 }
   0x3   :  { %16 = vsyncpa [#allocation4], 0  ;;  %s1342_s27 = smov [#allocation5]  }
   0x4   :  { %s34_s28 = sshll.u32 %s1342_s27, 4  ;;  %s35_s28 = int_to_ptr.vmem [resolvable:$true] %s34_s28 }
   0x5   :  { %s1242_s29 = scalar_lea.vmem %s35_s28, 4096  ;;  %p1247_p1 = scmp.lt.s32.totalorder %s35_s28, %s35_s28 }
   0x6   :  { %p1243_p0 = scmp.ne.s32.totalorder %s35_s28, %s1242_s29  ;;  %p1248_p2 = scmp.lt.s32.totalorder %s1242_s29, %s1242_s29 }
   0x8   :  { %p1249_p3 = por %p1248_p2, %p1247_p1 }
   0xa   :  { %p1250_p4 = pnand %p1249_p3, %p1243_p0 }
   0xc   :  { %1253 = shalt.err (!%p1250_p4)
}
   0xd   :  { %s1343_s30 = smov 256   ;;  %s1344_s9 = smov 16  }
   0xe   :  { %40 = dma.hbm_to_vmem [thread:$0]  %s1907_s1, 4096, %s35_s28, [#allocation6], %s1343_s30, %s1343_s30, %s1344_s9  }
   0xf   :  { %s1345_s12 = smov [#allocation2]  }
  0x10   :  { %s22_s13 = sshll.u32 %s1345_s12, 4  ;;  %s23_s13 = int_to_ptr.vmem [resolvable:$true] %s22_s13 }
  0x11   :  { %s1262_s14 = scalar_lea.vmem %s23_s13, 1024  ;;  %p1267_p6 = scmp.lt.s32.totalorder %s23_s13, %s23_s13 }
  0x12   :  { %p1263_p5 = scmp.ne.s32.totalorder %s23_s13, %s1262_s14  ;;  %p1268_p7 = scmp.lt.s32.totalorder %s1262_s14, %s1262_s14 }
  0x14   :  { %p1269_p8 = por %p1268_p7, %p1267_p6 }
  0x16   :  { %p1270_p9 = pnand %p1269_p8, %p1263_p5 }
  0x18   :  { %1273 = shalt.err (!%p1270_p9)
}
  0x19   :  { %s1346_s15 = smov 128   ;;  %s1347_s16 = smov 8  }
  0x1a   :  { %28 = dma.hbm_to_vmem [thread:$0]  %s1906_s0, 1024, %s23_s13, [#allocation3], %s1346_s15, %s1346_s15, %s1347_s16  }
  0x1b   :  { %s1348_s19 = smov [#allocation7]   ;;  %s1349_s21 = smov [#allocation8]  }
  0x1c   :  { %s46_s20 = sshll.u32 %s1348_s19, 4  ;;  %s64_s1 = sshll.u32 %s1349_s21, 4  ;;  %s47_s20 = int_to_ptr.vmem [resolvable:$true] %s46_s20  ;;  %s65_s1 = int_to_ptr.vmem [resolvable:$true] %s64_s1 }
  0x1d   :  { %s1282_s22 = scalar_lea.vmem %s47_s20, 4096  ;;  %p1287_p11 = scmp.lt.s32.totalorder %s47_s20, %s47_s20 }
  0x1e   :  { %p1283_p10 = scmp.ne.s32.totalorder %s47_s20, %s1282_s22  ;;  %p1288_p12 = scmp.lt.s32.totalorder %s1282_s22, %s1282_s22 }
  0x20   :  { %p1289_p13 = por %p1288_p12, %p1287_p11 }
  0x22   :  { %p1290_p0 = pnand %p1289_p13, %p1283_p10 }
  0x24   :  { %1293 = shalt.err (!%p1290_p0)
}
  0x25   :  { %52 = dma.hbm_to_vmem [thread:$0]  %s1908_s2, 4096, %s47_s20, [#allocation6], %s1343_s30, %s1343_s30, %s1344_s9  }
  0x26   :  { %s1302_s0 = scalar_lea.vmem %s65_s1, 2048  ;;  %p1307_p2 = scmp.lt.s32.totalorder %s65_s1, %s65_s1 }
  0x27   :  { %p1303_p1 = scmp.ne.s32.totalorder %s65_s1, %s1302_s0  ;;  %p1308_p3 = scmp.lt.s32.totalorder %s1302_s0, %s1302_s0 }
  0x29   :  { %p1309_p4 = por %p1308_p3, %p1307_p2 }
  0x2b   :  { %p1310_p5 = pnand %p1309_p4, %p1303_p1 }
  0x2d   :  { %1313 = shalt.err (!%p1310_p5)
}
  0x2e   :  { %70 = dma.hbm_to_vmem [thread:$0]  %s1912_s6, 2048, %s65_s1, [#allocation9], %s1346_s15, %s1346_s15, %s1347_s16  }
  0x2f   :  { %1334 = dma.done.wait [#allocation3], 1024  }
  0x30   :  { %1335 = vsyncadd [#allocation3], 4294966272 }
  0x31   :  { %1336 = dma.done.wait [#allocation6], 8192  }
  0x32   :  { %1337 = vsyncadd [#allocation6], 4294959104 }
  0x33   :  { %1338 = dma.done.wait [#allocation9], 2048  }
  0x34   :  { %1339 = vsyncadd [#allocation9], 4294965248  ;;  %v1915_v0 = vmov 0.0   ;;  %v124_v1 = vld [vmem:[#allocation5 + $0xf8] sm:$0xff]  ;;  %v123_v3 = vld [vmem:[#allocation5 + $0xf0] sm:$0xff]  ;;  %vm1352_vm0 = vmmov 0  }
  0x35   :  { %201 = vmatprep.mubr.f32.mxu0 %v1915_v0  ;;  %348 = vmatprep.mubr.f32.mxu1 %v1915_v0  ;;  %v1419_v2 = vld [vmem:[#allocation7 + $0xf8] sm:$0xff]  ;;  %v1422_v4 = vld [vmem:[#allocation7 + $0xf0] sm:$0xff]  ;;  %v122_v5 = vld [vmem:[#allocation5 + $0xe8] sm:$0xff]  ;;  %s1353_s9 = smov [#allocation10]  }
  0x36   :  { %137 = vmatprep.subr.mxu0 %v124_v1  ;;  %284 = vmatprep.subr.mxu1 %v1419_v2  ;;  %v1424_v6 = vld [vmem:[#allocation7 + $0xe8] sm:$0xff]  ;;  %v121_v7 = vld [vmem:[#allocation5 + $0xe0] sm:$0xff]  ;;  %v120_v9 = vld [vmem:[#allocation5 + $0xd8] sm:$0xff]  ;;  %s1110_s10 = sshll.u32 %s1353_s9, 4  ;;  %s1111_s10 = int_to_ptr.vmem [resolvable:$true] %s1110_s10 }
  0x37   :  { %138 = vmatpush1.msra.mxu0 %v123_v3  ;;  %285 = vmatpush1.msra.mxu1 %v1422_v4  ;;  %v1427_v8 = vld [vmem:[#allocation7 + $0xe0] sm:$0xff]  ;;  %v1430_v10 = vld [vmem:[#allocation7 + $0xd8] sm:$0xff]  ;;  %v119_v11 = vld [vmem:[#allocation5 + $0xd0] sm:$0xff]  ;;  %s1314_s11 = scalar_lea.vmem %s1111_s10, 128  ;;  %p1319_p7 = scmp.lt.s32.totalorder %s1111_s10, %s1111_s10 }
  0x38   :  { %139 = vmatprep.subr.mxu0 %v122_v5  ;;  %286 = vmatprep.subr.mxu1 %v1424_v6  ;;  %v1432_v12 = vld [vmem:[#allocation7 + $0xd0] sm:$0xff]  ;;  %v118_v13 = vld [vmem:[#allocation5 + $0xc8] sm:$0xff]  ;;  %v117_v15 = vld [vmem:[#allocation5 + $0xc0] sm:$0xff]  ;;  %p1315_p6 = scmp.ne.s32.totalorder %s1111_s10, %s1314_s11  ;;  %p1320_p8 = scmp.lt.s32.totalorder %s1314_s11, %s1314_s11 }
  0x39   :  { %140 = vmatpush1.msra.mxu0 %v121_v7  ;;  %287 = vmatpush1.msra.mxu1 %v1427_v8  ;;  %v1435_v14 = vld [vmem:[#allocation7 + $0xc8] sm:$0xff]  ;;  %v1438_v16 = vld [vmem:[#allocation7 + $0xc0] sm:$0xff]  ;;  %v116_v17 = vld [vmem:[#allocation5 + $0xb8] sm:$0xff] }
  0x3a   :  { %141 = vmatprep.subr.mxu0 %v120_v9  ;;  %288 = vmatprep.subr.mxu1 %v1430_v10  ;;  %v1441_v18 = vld [vmem:[#allocation7 + $0xb8] sm:$0xff]  ;;  %v115_v19 = vld [vmem:[#allocation5 + $0xb0] sm:$0xff]  ;;  %v114_v21 = vld [vmem:[#allocation5 + $0xa8] sm:$0xff]  ;;  %p1321_p9 = por %p1320_p8, %p1319_p7 }
  0x3b   :  { %142 = vmatpush1.msra.mxu0 %v119_v11  ;;  %289 = vmatpush1.msra.mxu1 %v1432_v12  ;;  %v1444_v20 = vld [vmem:[#allocation7 + $0xb0] sm:$0xff]  ;;  %v1447_v22 = vld [vmem:[#allocation7 + $0xa8] sm:$0xff]  ;;  %v113_v23 = vld [vmem:[#allocation5 + $0xa0] sm:$0xff]  ;;  %v127_v11 = vlaneseq }
  0x3c   :  { %143 = vmatprep.subr.mxu0 %v118_v13  ;;  %290 = vmatprep.subr.mxu1 %v1435_v14  ;;  %v1450_v24 = vld [vmem:[#allocation7 + $0xa0] sm:$0xff]  ;;  %v112_v25 = vld [vmem:[#allocation5 + $0x98] sm:$0xff]  ;;  %v111_v27 = vld [vmem:[#allocation5 + $0x90] sm:$0xff]  ;;  %p1322_p10 = pnand %p1321_p9, %p1315_p6 }
  0x3d   :  { %144 = vmatpush1.msra.mxu0 %v117_v15  ;;  %291 = vmatpush1.msra.mxu1 %v1438_v16  ;;  %v1453_v26 = vld [vmem:[#allocation7 + $0x98] sm:$0xff]  ;;  %v1456_v28 = vld [vmem:[#allocation7 + $0x90] sm:$0xff]  ;;  %v110_v29 = vld [vmem:[#allocation5 + $0x88] sm:$0xff]  ;;  %v128_v13 = vshrl.u32 %v127_v11, 7 }
  0x3e   :  { %145 = vmatprep.subr.mxu0 %v116_v17  ;;  %292 = vmatprep.subr.mxu1 %v1441_v18  ;;  %v1459_v30 = vld [vmem:[#allocation7 + $0x88] sm:$0xff]  ;;  %v109_v31 = vld [vmem:[#allocation5 + $0x80] sm:$0xff]  ;;  %v108_v33 = vld [vmem:[#allocation5 + $0x78] sm:$0xff] }
  0x3f   :  { %146 = vmatpush1.msra.mxu0 %v115_v19  ;;  %293 = vmatpush1.msra.mxu1 %v1444_v20  ;;  %v1462_v32 = vld [vmem:[#allocation7 + $0x80] sm:$0xff]  ;;  %v1465_v34 = vld [vmem:[#allocation7 + $0x78] sm:$0xff]  ;;  %v107_v35 = vld [vmem:[#allocation5 + $0x70] sm:$0xff]  ;;  %v129_v15 = vsub.s32 0, %v128_v13  ;;  %v133_v19 = vsub.s32 1, %v128_v13 }
  0x40   :  { %147 = vmatprep.subr.mxu0 %v114_v21  ;;  %294 = vmatprep.subr.mxu1 %v1447_v22  ;;  %v1468_v36 = vld [vmem:[#allocation7 + $0x70] sm:$0xff]  ;;  %v106_v37 = vld [vmem:[#allocation5 + $0x68] sm:$0xff]  ;;  %v105_v39 = vld [vmem:[#allocation5 + $0x60] sm:$0xff] }
  0x41   :  { %148 = vmatpush1.msra.mxu0 %v113_v23  ;;  %295 = vmatpush1.msra.mxu1 %v1450_v24  ;;  %v1471_v38 = vld [vmem:[#allocation7 + $0x68] sm:$0xff]  ;;  %v1474_v40 = vld [vmem:[#allocation7 + $0x60] sm:$0xff]  ;;  %v104_v41 = vld [vmem:[#allocation5 + $0x58] sm:$0xff] }
  0x42   :  { %149 = vmatprep.subr.mxu0 %v112_v25  ;;  %296 = vmatprep.subr.mxu1 %v1453_v26  ;;  %v1477_v42 = vld [vmem:[#allocation7 + $0x58] sm:$0xff]  ;;  %v103_v43 = vld [vmem:[#allocation5 + $0x50] sm:$0xff]  ;;  %v102_v45 = vld [vmem:[#allocation5 + $0x48] sm:$0xff] }
  0x43   :  { %150 = vmatpush1.msra.mxu0 %v111_v27  ;;  %297 = vmatpush1.msra.mxu1 %v1456_v28  ;;  %v1480_v44 = vld [vmem:[#allocation7 + $0x50] sm:$0xff]  ;;  %v1483_v46 = vld [vmem:[#allocation7 + $0x48] sm:$0xff]  ;;  %v101_v47 = vld [vmem:[#allocation5 + $0x40] sm:$0xff] }
  0x44   :  { %151 = vmatprep.subr.mxu0 %v110_v29  ;;  %298 = vmatprep.subr.mxu1 %v1459_v30  ;;  %v1486_v48 = vld [vmem:[#allocation7 + $0x40] sm:$0xff]  ;;  %v100_v49 = vld [vmem:[#allocation5 + $0x38] sm:$0xff]  ;;  %v99_v51 = vld [vmem:[#allocation5 + $0x30] sm:$0xff] }
  0x45   :  { %152 = vmatpush1.msra.mxu0 %v109_v31  ;;  %299 = vmatpush1.msra.mxu1 %v1462_v32  ;;  %v1489_v50 = vld [vmem:[#allocation7 + $0x38] sm:$0xff]  ;;  %v1492_v52 = vld [vmem:[#allocation7 + $0x30] sm:$0xff]  ;;  %v98_v53 = vld [vmem:[#allocation5 + $0x28] sm:$0xff] }
  0x46   :  { %153 = vmatprep.subr.mxu0 %v108_v33  ;;  %300 = vmatprep.subr.mxu1 %v1465_v34  ;;  %v1495_v54 = vld [vmem:[#allocation7 + $0x28] sm:$0xff]  ;;  %v97_v55 = vld [vmem:[#allocation5 + $0x20] sm:$0xff]  ;;  %v96_v57 = vld [vmem:[#allocation5 + $0x18] sm:$0xff] }
  0x47   :  { %154 = vmatpush1.msra.mxu0 %v107_v35  ;;  %301 = vmatpush1.msra.mxu1 %v1468_v36  ;;  %v1498_v56 = vld [vmem:[#allocation7 + $0x20] sm:$0xff]  ;;  %v1501_v58 = vld [vmem:[#allocation7 + $0x18] sm:$0xff]  ;;  %v95_v59 = vld [vmem:[#allocation5 + $0x10] sm:$0xff] }
  0x48   :  { %155 = vmatprep.subr.mxu0 %v106_v37  ;;  %302 = vmatprep.subr.mxu1 %v1471_v38  ;;  %v1504_v60 = vld [vmem:[#allocation7 + $0x10] sm:$0xff]  ;;  %v94_v61 = vld [vmem:[#allocation5 + $0x8] sm:$0xff]  ;;  %v93_v63 = vld [vmem:[#allocation5] sm:$0xff] }
  0x49   :  { %156 = vmatpush1.msra.mxu0 %v105_v39  ;;  %303 = vmatpush1.msra.mxu1 %v1474_v40  ;;  %v1507_v62 = vld [vmem:[#allocation7 + $0x8] sm:$0xff]  ;;  %v1510_v1 = vld [vmem:[#allocation7] sm:$0xff]  ;;  %v87_v7 = vld [vmem:[#allocation2 + $0x10] sm:$0xff] }
  0x4a   :  { %157 = vmatprep.subr.mxu0 %v104_v41  ;;  %304 = vmatprep.subr.mxu1 %v1477_v42  ;;  %v85_v3 = vld [vmem:[#allocation2] sm:$0xff]  ;;  %v86_v5 = vld [vmem:[#allocation2 + $0x8] sm:$0xff]  ;;  %v88_v9 = vld [vmem:[#allocation2 + $0x18] sm:$0xff] }
  0x4b   :  { %158 = vmatpush1.msra.mxu0 %v103_v43  ;;  %305 = vmatpush1.msra.mxu1 %v1480_v44  ;;  %v125_v17 = vld [vmem:[%s1909_s3] sm:$0x3] }
  0x4c   :  { %159 = vmatprep.subr.mxu0 %v102_v45  ;;  %306 = vmatprep.subr.mxu1 %v1483_v46  ;;  %v1590_v21 = vrot.slane %v125_v17, %v129_v15  ;;  %v1592_v23 = vrot.slane %v125_v17, %v133_v19  ;;  %v89_v41 = vld [vmem:[#allocation2 + $0x20] sm:$0xff] }
  0x4d   :  { %160 = vmatpush1.msra.mxu0 %v101_v47  ;;  %307 = vmatpush1.msra.mxu1 %v1486_v48  ;;  %v282_v43 = vld [vmem:[%s1910_s4] sm:$0x3]  ;;  %s1351_s4 = smov 64  }
  0x4e   :  { %161 = vmatprep.subr.mxu0 %v100_v49  ;;  %308 = vmatprep.subr.mxu1 %v1489_v50  ;;  %v283_v45 = vld [vmem:[%s1911_s5] sm:$0x3]  ;;  %v1603_v47 = vrot.slane %v282_v43, %v129_v15  ;;  %v90_v49 = vld [vmem:[#allocation2 + $0x28] sm:$0xff] }
  0x4f   :  { %162 = vmatpush1.msra.mxu0 %v99_v51  ;;  %309 = vmatpush1.msra.mxu1 %v1492_v52  ;;  %v1605_v51 = vrot.slane %v282_v43, %v133_v19 }
  0x50   :  { %163 = vmatprep.subr.mxu0 %v98_v53  ;;  %310 = vmatprep.subr.mxu1 %v1495_v54  ;;  %v1607_v53 = vrot.slane %v283_v45, %v129_v15 }
  0x51   :  { %164 = vmatpush1.msra.mxu0 %v97_v55  ;;  %311 = vmatpush1.msra.mxu1 %v1498_v56 }
  0x52   :  { %165 = vmatprep.subr.mxu0 %v96_v57  ;;  %312 = vmatprep.subr.mxu1 %v1501_v58 }
  0x53   :  { %166 = vmatpush1.msra.mxu0 %v95_v59  ;;  %313 = vmatpush1.msra.mxu1 %v1504_v60  ;;  %v91_v59 = vld [vmem:[#allocation2 + $0x30] sm:$0xff] }
  0x54   :  { %167 = vmatprep.subr.mxu0 %v94_v61  ;;  %314 = vmatprep.subr.mxu1 %v1507_v62 }
  0x55   :  { %168 = vmatpush1.msra.mxu0 %v93_v63  ;;  %315 = vmatpush1.msra.mxu1 %v1510_v1  ;;  %v1611_v63 = vrot.slane %v283_v45, %v133_v19 }
  0x56   :  { %202 = vmatmul.mubr.f32.vlgmr.msra.gmra.mxu0 %v85_v3  ;;  %349 = vmatmul.mubr.f32.vlgmr.msra.gmra.mxu1 %v1915_v0 }
  0x57   :  { %394 = vmatprep.subr.mxu0 %v1419_v2  ;;  %207 = vmatprep.mubr.f32.mxu0 %v1915_v0 }
  0x58   :  { %395 = vmatpush1.msra.mxu0 %v1422_v4  ;;  %482 = vmatprep.subr.mxu1 %v1419_v2 }
  0x59   :  { %396 = vmatprep.subr.mxu0 %v1424_v6  ;;  %483 = vmatpush1.msra.mxu1 %v1422_v4 }
  0x5a   :  { %397 = vmatpush1.msra.mxu0 %v1427_v8  ;;  %484 = vmatprep.subr.mxu1 %v1424_v6 }
  0x5b   :  { %398 = vmatprep.subr.mxu0 %v1430_v10  ;;  %485 = vmatpush1.msra.mxu1 %v1427_v8 }
  0x5c   :  { %399 = vmatpush1.msra.mxu0 %v1432_v12  ;;  %486 = vmatprep.subr.mxu1 %v1430_v10 }
  0x5d   :  { %400 = vmatprep.subr.mxu0 %v1435_v14  ;;  %487 = vmatpush1.msra.mxu1 %v1432_v12 }
  0x5e   :  { %401 = vmatpush1.msra.mxu0 %v1438_v16  ;;  %488 = vmatprep.subr.mxu1 %v1435_v14 }
  0x5f   :  { %402 = vmatprep.subr.mxu0 %v1441_v18  ;;  %489 = vmatpush1.msra.mxu1 %v1438_v16 }
  0x60   :  { %403 = vmatpush1.msra.mxu0 %v1444_v20  ;;  %490 = vmatprep.subr.mxu1 %v1441_v18 }
  0x61   :  { %404 = vmatprep.subr.mxu0 %v1447_v22  ;;  %491 = vmatpush1.msra.mxu1 %v1444_v20 }
  0x62   :  { %405 = vmatpush1.msra.mxu0 %v1450_v24  ;;  %492 = vmatprep.subr.mxu1 %v1447_v22 }
  0x63   :  { %406 = vmatprep.subr.mxu0 %v1453_v26  ;;  %493 = vmatpush1.msra.mxu1 %v1450_v24 }
  0x64   :  { %407 = vmatpush1.msra.mxu0 %v1456_v28  ;;  %494 = vmatprep.subr.mxu1 %v1453_v26 }
  0x65   :  { %408 = vmatprep.subr.mxu0 %v1459_v30  ;;  %495 = vmatpush1.msra.mxu1 %v1456_v28 }
  0x66   :  { %409 = vmatpush1.msra.mxu0 %v1462_v32  ;;  %496 = vmatprep.subr.mxu1 %v1459_v30 }
  0x67   :  { %410 = vmatprep.subr.mxu0 %v1465_v34  ;;  %497 = vmatpush1.msra.mxu1 %v1462_v32 }
  0x68   :  { %411 = vmatpush1.msra.mxu0 %v1468_v36  ;;  %498 = vmatprep.subr.mxu1 %v1465_v34 }
  0x69   :  { %412 = vmatprep.subr.mxu0 %v1471_v38  ;;  %499 = vmatpush1.msra.mxu1 %v1468_v36 }
  0x6a   :  { %413 = vmatpush1.msra.mxu0 %v1474_v40  ;;  %500 = vmatprep.subr.mxu1 %v1471_v38 }
  0x6b   :  { %414 = vmatprep.subr.mxu0 %v1477_v42  ;;  %501 = vmatpush1.msra.mxu1 %v1474_v40 }
  0x6c   :  { %415 = vmatpush1.msra.mxu0 %v1480_v44  ;;  %502 = vmatprep.subr.mxu1 %v1477_v42 }
  0x6d   :  { %416 = vmatprep.subr.mxu0 %v1483_v46  ;;  %503 = vmatpush1.msra.mxu1 %v1480_v44 }
  0x6e   :  { %417 = vmatpush1.msra.mxu0 %v1486_v48  ;;  %504 = vmatprep.subr.mxu1 %v1483_v46 }
  0x6f   :  { %418 = vmatprep.subr.mxu0 %v1489_v50  ;;  %505 = vmatpush1.msra.mxu1 %v1486_v48 }
  0x70   :  { %419 = vmatpush1.msra.mxu0 %v1492_v52  ;;  %506 = vmatprep.subr.mxu1 %v1489_v50 }
  0x71   :  { %420 = vmatprep.subr.mxu0 %v1495_v54  ;;  %507 = vmatpush1.msra.mxu1 %v1492_v52 }
  0x72   :  { %421 = vmatpush1.msra.mxu0 %v1498_v56  ;;  %508 = vmatprep.subr.mxu1 %v1495_v54 }
  0x73   :  { %422 = vmatprep.subr.mxu0 %v1501_v58  ;;  %509 = vmatpush1.msra.mxu1 %v1498_v56 }
  0x74   :  { %423 = vmatpush1.msra.mxu0 %v1504_v60  ;;  %510 = vmatprep.subr.mxu1 %v1501_v58 }
  0x75   :  { %424 = vmatprep.subr.mxu0 %v1507_v62  ;;  %511 = vmatpush1.msra.mxu1 %v1504_v60 }
  0x76   :  { %425 = vmatpush1.msra.mxu0 %v1510_v1  ;;  %512 = vmatprep.subr.mxu1 %v1507_v62 }
  0x77   :  { %513 = vmatpush1.msra.mxu1 %v1510_v1  ;;  %546 = vmatprep.mubr.f32.mxu1 %v1915_v0 }
  0x78   :  { %570 = vmatprep.subr.mxu0 %v1419_v2  ;;  %658 = vmatprep.subr.mxu1 %v1419_v2 }
  0x79   :  { %208 = vmatmul.mubr.f32.gmra.mxu0 %v86_v5 }
  0x7a   :  { %213 = vmatprep.mubr.f32.mxu0 %v1915_v0 }
  0x7d   :  { %214 = vmatmul.mubr.f32.gmra.mxu0 %v87_v7  ;;  %v92_v7 = vld [vmem:[#allocation2 + $0x38] sm:$0xff] }
  0x7e   :  { %219 = vmatprep.mubr.f32.mxu0 %v1915_v0 }
  0x81   :  { %220 = vmatmul.mubr.f32.gmra.mxu0 %v88_v9 }
  0x82   :  { %225 = vmatprep.mubr.f32.mxu0 %v1915_v0 }
  0x85   :  { %226 = vmatmul.mubr.f32.gmra.mxu0 %v89_v41 }
  0x86   :  { %231 = vmatprep.mubr.f32.mxu0 %v1915_v0 }
  0x89   :  { %232 = vmatmul.mubr.f32.gmra.mxu0 %v90_v49 }
  0x8a   :  { %237 = vmatprep.mubr.f32.mxu0 %v1915_v0 }
  0x8d   :  { %238 = vmatmul.mubr.f32.gmra.mxu0 %v91_v59 }
  0x8e   :  { %243 = vmatprep.mubr.f32.mxu0 %v1915_v0 }
  0x91   :  { %244 = vmatmul.mubr.f32.gmra.mxu0 %v92_v7 }
  0x92   :  { %458 = vmatprep.mubr.f32.mxu0 %v1915_v0 }
 0x116   :  { %v203_v25 = vpop.f32.mrf.mxu0  ;;  %v350_v27 = vpop.f32.mrf.mxu1 }
 0x117   :  { %v204_v29 = vadd.f32 %v203_v25, %v1590_v21 }
 0x118   :  { %v205_v31 = vpop.f32.mrf.mxu0  ;;  %v352_v37 = vpop.f32.mrf.mxu1 }
 0x119   :  { %v355_v33 = vadd.f32 %v350_v27, %v204_v29  ;;  %v206_v35 = vadd.f32 %v205_v31, %v1592_v23 }
 0x11b   :  { %1186 = vtanh.f32 %v355_v33  ;;  %v356_v39 = vadd.f32 %v352_v37, %v206_v35 }
 0x11d   :  { %1188 = vtanh.f32 %v356_v39 }
 0x128   :  { %v1187_v55 = vpop.eup %1186 }
 0x129   :  { %v370_v57 = vmul.f32 %v1187_v55, %v1603_v47 }
 0x12a   :  { %v1189_v61 = vpop.eup %1188 }
 0x12b   :  { %v383_v3 = vadd.f32 %v1607_v53, %v370_v57  ;;  %v371_v5 = vmul.f32 %v1189_v61, %v1605_v51 }
 0x12d   :  { %385 = vrot.lane.b32.xlu0 %v383_v3, %s1351_s4  ;;  %v384_v9 = vadd.f32 %v1611_v63, %v371_v5 }
 0x12f   :  { %v389_v13 = vmul.f32 0.0, %v384_v9 }
 0x131   :  { %387 = vrot.lane.b32.xlu0 %v384_v9, %s1351_s4 }
 0x139   :  { %v209_v29 = vpop.f32.mrf.mxu0 }
 0x13b   :  { %v211_v31 = vpop.f32.mrf.mxu0 }
 0x13c   :  { %v212_v7 = vadd.f32 %v211_v31, %v1592_v23 }
 0x13d   :  { %v1656_v33 = vpop.f32.mrf.mxu0 }
 0x13f   :  { %v1658_v35 = vpop.f32.mrf.mxu0 }
 0x141   :  { %v1660_v37 = vpop.f32.mrf.mxu0 }
 0x143   :  { %v1662_v39 = vpop.f32.mrf.mxu0 }
 0x145   :  { %v1664_v41 = vpop.f32.mrf.mxu0 }
 0x147   :  { %v1666_v43 = vpop.f32.mrf.mxu0 }
 0x149   :  { %v1668_v45 = vpop.f32.mrf.mxu0 }
 0x14b   :  { %v1670_v49 = vpop.f32.mrf.mxu0 }
 0x14d   :  { %v1672_v55 = vpop.f32.mrf.mxu0 }
 0x14f   :  { %v1674_v57 = vpop.f32.mrf.mxu0 }
 0x151   :  { %v1676_v59 = vpop.f32.mrf.mxu0 }
 0x153   :  { %v1678_v61 = vpop.f32.mrf.mxu0 }
 0x19f   :  { %v386_v11 = vpop.permute.xlu0 %385 }
 0x1a0   :  { %v390_v15 = vmul.f32 %v386_v11, %v383_v3  ;;  %v210_v3 = vadd.f32 %v209_v29, %v1590_v21 }
 0x1a2   :  { %v1620_v17 = vadd.f32 %v390_v15, %v389_v13 }
 0x1a3   :  { %v388_v25 = vpop.permute.xlu0 %387 }
 0x1a4   :  { %1190 = vtanh.f32 %v1620_v17 }
 0x1b1   :  { %v1191_v19 = vpop.eup %1190 }
 0x1b2   :  { %v393_v27 = vmul.f32 %v1191_v19, %v388_v25 }
 0x1b4   :  { %459 = vmatmul.mubr.f32.vlgmr.msra.gmra.mxu0 %v393_v27 }
 0x1b5   :  { %571 = vmatpush1.msra.mxu0 %v1422_v4  ;;  %634 = vmatprep.mubr.f32.mxu0 %v1915_v0 }
 0x1b6   :  { %572 = vmatprep.subr.mxu0 %v1424_v6 }
 0x1b7   :  { %573 = vmatpush1.msra.mxu0 %v1427_v8 }
 0x1b8   :  { %574 = vmatprep.subr.mxu0 %v1430_v10 }
 0x1b9   :  { %575 = vmatpush1.msra.mxu0 %v1432_v12 }
 0x1ba   :  { %576 = vmatprep.subr.mxu0 %v1435_v14 }
 0x1bb   :  { %577 = vmatpush1.msra.mxu0 %v1438_v16 }
 0x1bc   :  { %578 = vmatprep.subr.mxu0 %v1441_v18 }
 0x1bd   :  { %579 = vmatpush1.msra.mxu0 %v1444_v20 }
 0x1be   :  { %580 = vmatprep.subr.mxu0 %v1447_v22 }
 0x1bf   :  { %581 = vmatpush1.msra.mxu0 %v1450_v24 }
 0x1c0   :  { %582 = vmatprep.subr.mxu0 %v1453_v26 }
 0x1c1   :  { %583 = vmatpush1.msra.mxu0 %v1456_v28 }
 0x1c2   :  { %584 = vmatprep.subr.mxu0 %v1459_v30 }
 0x1c3   :  { %585 = vmatpush1.msra.mxu0 %v1462_v32 }
 0x1c4   :  { %586 = vmatprep.subr.mxu0 %v1465_v34 }
 0x1c5   :  { %587 = vmatpush1.msra.mxu0 %v1468_v36 }
 0x1c6   :  { %588 = vmatprep.subr.mxu0 %v1471_v38 }
 0x1c7   :  { %589 = vmatpush1.msra.mxu0 %v1474_v40 }
 0x1c8   :  { %590 = vmatprep.subr.mxu0 %v1477_v42 }
 0x1c9   :  { %591 = vmatpush1.msra.mxu0 %v1480_v44 }
 0x1ca   :  { %592 = vmatprep.subr.mxu0 %v1483_v46 }
 0x1cb   :  { %593 = vmatpush1.msra.mxu0 %v1486_v48 }
 0x1cc   :  { %594 = vmatprep.subr.mxu0 %v1489_v50 }
 0x1cd   :  { %595 = vmatpush1.msra.mxu0 %v1492_v52 }
 0x1ce   :  { %596 = vmatprep.subr.mxu0 %v1495_v54 }
 0x1cf   :  { %597 = vmatpush1.msra.mxu0 %v1498_v56 }
 0x1d0   :  { %598 = vmatprep.subr.mxu0 %v1501_v58 }
 0x1d1   :  { %599 = vmatpush1.msra.mxu0 %v1504_v60 }
 0x1d2   :  { %600 = vmatprep.subr.mxu0 %v1507_v62 }
 0x1d3   :  { %601 = vmatpush1.msra.mxu0 %v1510_v1 }
 0x1d4   :  { %746 = vmatprep.subr.mxu0 %v1419_v2 }
 0x274   :  { %v460_v5 = vpop.f32.mrf.mxu0 }
 0x275   :  { %v465_v9 = vadd.f32 %v460_v5, %v210_v3 }
 0x276   :  { %v462_v11 = vpop.f32.mrf.mxu0 }
 0x277   :  { %1192 = vtanh.f32 %v465_v9  ;;  %v466_v13 = vadd.f32 %v462_v11, %v212_v7 }
 0x279   :  { %1194 = vtanh.f32 %v466_v13 }
 0x284   :  { %v1193_v15 = vpop.eup %1192 }
 0x285   :  { %v469_v19 = vmul.f32 %v1193_v15, %v1603_v47  ;;  %v1917_v15 = vmov 0.0  }
 0x286   :  { %v1195_v25 = vpop.eup %1194 }
 0x287   :  { %v471_v27 = vadd.f32 %v469_v19, %v1607_v53  ;;  %v470_v0 = vmul.f32 %v1195_v25, %v1605_v51  ;;  %v218_v19 = vadd.f32 %v1658_v35, %v1592_v23 }
 0x289   :  { %473 = vrot.lane.b32.xlu1 %v471_v27, %s1351_s4  ;;  %v472_v29 = vadd.f32 %v470_v0, %v1611_v63  ;;  %v216_v0 = vadd.f32 %v1656_v33, %v1590_v21 }
 0x28b   :  { %v477_v3 = vmul.f32 %v472_v29, %v1620_v17 }
 0x28d   :  { %475 = vrot.lane.b32.xlu1 %v472_v29, %s1351_s4 }
 0x2fb   :  { %v474_v31 = vpop.permute.xlu1 %473 }
 0x2fc   :  { %v478_v5 = vmul.f32 %v474_v31, %v471_v27 }
 0x2fe   :  { %v479_v7 = vadd.f32 %v478_v5, %v477_v3 }
 0x2ff   :  { %v476_v11 = vpop.permute.xlu1 %475 }
 0x300   :  { %1196 = vtanh.f32 %v479_v7 }
 0x30d   :  { %v1197_v9 = vpop.eup %1196 }
 0x30e   :  { %v481_v13 = vmul.f32 %v1197_v9, %v476_v11 }
 0x310   :  { %547 = vmatmul.mubr.f32.vlgmr.msra.gmra.mxu1 %v481_v13 }
 0x311   :  { %659 = vmatpush1.msra.mxu1 %v1422_v4  ;;  %722 = vmatprep.mubr.f32.mxu1 %v1917_v15 }
 0x312   :  { %660 = vmatprep.subr.mxu1 %v1424_v6 }
 0x313   :  { %661 = vmatpush1.msra.mxu1 %v1427_v8 }
 0x314   :  { %662 = vmatprep.subr.mxu1 %v1430_v10 }
 0x315   :  { %663 = vmatpush1.msra.mxu1 %v1432_v12 }
 0x316   :  { %664 = vmatprep.subr.mxu1 %v1435_v14 }
 0x317   :  { %665 = vmatpush1.msra.mxu1 %v1438_v16 }
 0x318   :  { %666 = vmatprep.subr.mxu1 %v1441_v18 }
 0x319   :  { %667 = vmatpush1.msra.mxu1 %v1444_v20 }
 0x31a   :  { %668 = vmatprep.subr.mxu1 %v1447_v22 }
 0x31b   :  { %669 = vmatpush1.msra.mxu1 %v1450_v24 }
 0x31c   :  { %670 = vmatprep.subr.mxu1 %v1453_v26 }
 0x31d   :  { %671 = vmatpush1.msra.mxu1 %v1456_v28 }
 0x31e   :  { %672 = vmatprep.subr.mxu1 %v1459_v30 }
 0x31f   :  { %673 = vmatpush1.msra.mxu1 %v1462_v32 }
 0x320   :  { %674 = vmatprep.subr.mxu1 %v1465_v34 }
 0x321   :  { %675 = vmatpush1.msra.mxu1 %v1468_v36 }
 0x322   :  { %676 = vmatprep.subr.mxu1 %v1471_v38 }
 0x323   :  { %677 = vmatpush1.msra.mxu1 %v1474_v40 }
 0x324   :  { %678 = vmatprep.subr.mxu1 %v1477_v42 }
 0x325   :  { %679 = vmatpush1.msra.mxu1 %v1480_v44 }
 0x326   :  { %680 = vmatprep.subr.mxu1 %v1483_v46 }
 0x327   :  { %681 = vmatpush1.msra.mxu1 %v1486_v48 }
 0x328   :  { %682 = vmatprep.subr.mxu1 %v1489_v50 }
 0x329   :  { %683 = vmatpush1.msra.mxu1 %v1492_v52 }
 0x32a   :  { %684 = vmatprep.subr.mxu1 %v1495_v54 }
 0x32b   :  { %685 = vmatpush1.msra.mxu1 %v1498_v56 }
 0x32c   :  { %686 = vmatprep.subr.mxu1 %v1501_v58 }
 0x32d   :  { %687 = vmatpush1.msra.mxu1 %v1504_v60 }
 0x32e   :  { %688 = vmatprep.subr.mxu1 %v1507_v62 }
 0x32f   :  { %689 = vmatpush1.msra.mxu1 %v1510_v1 }
 0x330   :  { %834 = vmatprep.subr.mxu1 %v1419_v2 }
 0x3d0   :  { %v548_v17 = vpop.f32.mrf.mxu1 }
 0x3d1   :  { %v553_v25 = vadd.f32 %v548_v17, %v216_v0 }
 0x3d2   :  { %v550_v27 = vpop.f32.mrf.mxu1 }
 0x3d3   :  { %1198 = vtanh.f32 %v553_v25  ;;  %v554_v29 = vadd.f32 %v550_v27, %v218_v19 }
 0x3d5   :  { %1200 = vtanh.f32 %v554_v29 }
 0x3e0   :  { %v1199_v31 = vpop.eup %1198 }
 0x3e1   :  { %v557_v3 = vmul.f32 %v1199_v31, %v1603_v47  ;;  %v224_v31 = vadd.f32 %v1662_v39, %v1592_v23 }
 0x3e2   :  { %v1201_v5 = vpop.eup %1200 }
 0x3e3   :  { %v559_v9 = vadd.f32 %v557_v3, %v1607_v53  ;;  %v558_v11 = vmul.f32 %v1201_v5, %v1605_v51 }
 0x3e5   :  { %561 = vrot.lane.b32.xlu0 %v559_v9, %s1351_s4  ;;  %v560_v33 = vadd.f32 %v558_v11, %v1611_v63 }
 0x3e7   :  { %563 = vrot.lane.b32.xlu1 %v560_v33, %s1351_s4  ;;  %v565_v13 = vmul.f32 %v560_v33, %v479_v7  ;;  %v222_v7 = vadd.f32 %v1660_v37, %v1590_v21 }
 0x457   :  { %v562_v35 = vpop.permute.xlu0 %561 }
 0x458   :  { %v566_v0 = vmul.f32 %v562_v35, %v559_v9 }
 0x459   :  { %v564_v25 = vpop.permute.xlu1 %563 }
 0x45a   :  { %v567_v17 = vadd.f32 %v566_v0, %v565_v13 }
 0x45c   :  { %1202 = vtanh.f32 %v567_v17 }
 0x469   :  { %v1203_v19 = vpop.eup %1202 }
 0x46a   :  { %v569_v27 = vmul.f32 %v1203_v19, %v564_v25 }
 0x46c   :  { %635 = vmatmul.mubr.f32.vlgmr.msra.gmra.mxu0 %v569_v27 }
 0x46d   :  { %747 = vmatpush1.msra.mxu0 %v1422_v4  ;;  %810 = vmatprep.mubr.f32.mxu0 %v1917_v15 }
 0x46e   :  { %748 = vmatprep.subr.mxu0 %v1424_v6 }
 0x46f   :  { %749 = vmatpush1.msra.mxu0 %v1427_v8 }
 0x470   :  { %750 = vmatprep.subr.mxu0 %v1430_v10 }
 0x471   :  { %751 = vmatpush1.msra.mxu0 %v1432_v12 }
 0x472   :  { %752 = vmatprep.subr.mxu0 %v1435_v14 }
 0x473   :  { %753 = vmatpush1.msra.mxu0 %v1438_v16 }
 0x474   :  { %754 = vmatprep.subr.mxu0 %v1441_v18 }
 0x475   :  { %755 = vmatpush1.msra.mxu0 %v1444_v20 }
 0x476   :  { %756 = vmatprep.subr.mxu0 %v1447_v22 }
 0x477   :  { %757 = vmatpush1.msra.mxu0 %v1450_v24 }
 0x478   :  { %758 = vmatprep.subr.mxu0 %v1453_v26 }
 0x479   :  { %759 = vmatpush1.msra.mxu0 %v1456_v28 }
 0x47a   :  { %760 = vmatprep.subr.mxu0 %v1459_v30 }
 0x47b   :  { %761 = vmatpush1.msra.mxu0 %v1462_v32 }
 0x47c   :  { %762 = vmatprep.subr.mxu0 %v1465_v34 }
 0x47d   :  { %763 = vmatpush1.msra.mxu0 %v1468_v36 }
 0x47e   :  { %764 = vmatprep.subr.mxu0 %v1471_v38 }
 0x47f   :  { %765 = vmatpush1.msra.mxu0 %v1474_v40 }
 0x480   :  { %766 = vmatprep.subr.mxu0 %v1477_v42 }
 0x481   :  { %767 = vmatpush1.msra.mxu0 %v1480_v44 }
 0x482   :  { %768 = vmatprep.subr.mxu0 %v1483_v46 }
 0x483   :  { %769 = vmatpush1.msra.mxu0 %v1486_v48 }
 0x484   :  { %770 = vmatprep.subr.mxu0 %v1489_v50 }
 0x485   :  { %771 = vmatpush1.msra.mxu0 %v1492_v52 }
 0x486   :  { %772 = vmatprep.subr.mxu0 %v1495_v54 }
 0x487   :  { %773 = vmatpush1.msra.mxu0 %v1498_v56 }
 0x488   :  { %774 = vmatprep.subr.mxu0 %v1501_v58 }
 0x489   :  { %775 = vmatpush1.msra.mxu0 %v1504_v60 }
 0x48a   :  { %776 = vmatprep.subr.mxu0 %v1507_v62 }
 0x48b   :  { %777 = vmatpush1.msra.mxu0 %v1510_v1 }
 0x48c   :  { %922 = vmatprep.subr.mxu0 %v1419_v2 }
 0x52c   :  { %v636_v29 = vpop.f32.mrf.mxu0 }
 0x52d   :  { %v641_v3 = vadd.f32 %v636_v29, %v222_v7 }
 0x52e   :  { %v638_v5 = vpop.f32.mrf.mxu0 }
 0x52f   :  { %1204 = vtanh.f32 %v641_v3  ;;  %v642_v9 = vadd.f32 %v638_v5, %v224_v31  ;;  %v230_v3 = vadd.f32 %v1666_v43, %v1592_v23 }
 0x531   :  { %1206 = vtanh.f32 %v642_v9 }
 0x53c   :  { %v1205_v11 = vpop.eup %1204 }
 0x53d   :  { %v645_v33 = vmul.f32 %v1205_v11, %v1603_v47 }
 0x53e   :  { %v1207_v35 = vpop.eup %1206 }
 0x53f   :  { %v647_v13 = vadd.f32 %v645_v33, %v1607_v53  ;;  %v646_v2 = vmul.f32 %v1207_v35, %v1605_v51 }
 0x541   :  { %649 = vrot.lane.b32.xlu0 %v647_v13, %s1351_s4  ;;  %v648_v37 = vadd.f32 %v646_v2, %v1611_v63 }
 0x543   :  { %651 = vrot.lane.b32.xlu1 %v648_v37, %s1351_s4  ;;  %v653_v0 = vmul.f32 %v648_v37, %v567_v17  ;;  %v228_v17 = vadd.f32 %v1664_v41, %v1590_v21 }
 0x5b3   :  { %v650_v39 = vpop.permute.xlu0 %649 }
 0x5b4   :  { %v654_v19 = vmul.f32 %v650_v39, %v647_v13 }
 0x5b5   :  { %v652_v7 = vpop.permute.xlu1 %651 }
 0x5b6   :  { %v655_v25 = vadd.f32 %v654_v19, %v653_v0 }
 0x5b8   :  { %1208 = vtanh.f32 %v655_v25 }
 0x5c5   :  { %v1209_v27 = vpop.eup %1208 }
 0x5c6   :  { %v657_v29 = vmul.f32 %v1209_v27, %v652_v7 }
 0x5c8   :  { %723 = vmatmul.mubr.f32.vlgmr.msra.gmra.mxu1 %v657_v29 }
 0x5c9   :  { %835 = vmatpush1.msra.mxu1 %v1422_v4  ;;  %898 = vmatprep.mubr.f32.mxu1 %v1917_v15 }
 0x5ca   :  { %836 = vmatprep.subr.mxu1 %v1424_v6 }
 0x5cb   :  { %837 = vmatpush1.msra.mxu1 %v1427_v8 }
 0x5cc   :  { %838 = vmatprep.subr.mxu1 %v1430_v10 }
 0x5cd   :  { %839 = vmatpush1.msra.mxu1 %v1432_v12 }
 0x5ce   :  { %840 = vmatprep.subr.mxu1 %v1435_v14 }
 0x5cf   :  { %841 = vmatpush1.msra.mxu1 %v1438_v16 }
 0x5d0   :  { %842 = vmatprep.subr.mxu1 %v1441_v18 }
 0x5d1   :  { %843 = vmatpush1.msra.mxu1 %v1444_v20 }
 0x5d2   :  { %844 = vmatprep.subr.mxu1 %v1447_v22 }
 0x5d3   :  { %845 = vmatpush1.msra.mxu1 %v1450_v24 }
 0x5d4   :  { %846 = vmatprep.subr.mxu1 %v1453_v26 }
 0x5d5   :  { %847 = vmatpush1.msra.mxu1 %v1456_v28 }
 0x5d6   :  { %848 = vmatprep.subr.mxu1 %v1459_v30 }
 0x5d7   :  { %849 = vmatpush1.msra.mxu1 %v1462_v32 }
 0x5d8   :  { %850 = vmatprep.subr.mxu1 %v1465_v34 }
 0x5d9   :  { %851 = vmatpush1.msra.mxu1 %v1468_v36 }
 0x5da   :  { %852 = vmatprep.subr.mxu1 %v1471_v38 }
 0x5db   :  { %853 = vmatpush1.msra.mxu1 %v1474_v40 }
 0x5dc   :  { %854 = vmatprep.subr.mxu1 %v1477_v42 }
 0x5dd   :  { %855 = vmatpush1.msra.mxu1 %v1480_v44 }
 0x5de   :  { %856 = vmatprep.subr.mxu1 %v1483_v46 }
 0x5df   :  { %857 = vmatpush1.msra.mxu1 %v1486_v48 }
 0x5e0   :  { %858 = vmatprep.subr.mxu1 %v1489_v50 }
 0x5e1   :  { %859 = vmatpush1.msra.mxu1 %v1492_v52 }
 0x5e2   :  { %860 = vmatprep.subr.mxu1 %v1495_v54 }
 0x5e3   :  { %861 = vmatpush1.msra.mxu1 %v1498_v56 }
 0x5e4   :  { %862 = vmatprep.subr.mxu1 %v1501_v58 }
 0x5e5   :  { %863 = vmatpush1.msra.mxu1 %v1504_v60 }
 0x5e6   :  { %864 = vmatprep.subr.mxu1 %v1507_v62 }
 0x5e7   :  { %865 = vmatpush1.msra.mxu1 %v1510_v1 }
 0x5e8   :  { %1139 = vmatprep.subr.mxu1 %v1917_v15 }
 0x688   :  { %v724_v31 = vpop.f32.mrf.mxu1 }
 0x689   :  { %v729_v5 = vadd.f32 %v724_v31, %v228_v17 }
 0x68a   :  { %v726_v9 = vpop.f32.mrf.mxu1 }
 0x68b   :  { %1210 = vtanh.f32 %v729_v5  ;;  %v730_v11 = vadd.f32 %v726_v9, %v230_v3  ;;  %v1025_v3 = vld [vmem:[#allocation8 + $0x78] sm:$0xff]  ;;  %v1024_v5 = vld [vmem:[#allocation8 + $0x70] sm:$0xff]  ;;  %v1023_v9 = vld [vmem:[#allocation8 + $0x68] sm:$0xff] }
 0x68d   :  { %1212 = vtanh.f32 %v730_v11  ;;  %v1022_v11 = vld [vmem:[#allocation8 + $0x60] sm:$0xff] }
 0x698   :  { %v1211_v33 = vpop.eup %1210 }
 0x699   :  { %v733_v35 = vmul.f32 %v1211_v33, %v1603_v47  ;;  %v1021_v33 = vld [vmem:[#allocation8 + $0x58] sm:$0xff] }
 0x69a   :  { %v1213_v13 = vpop.eup %1212 }
 0x69b   :  { %v735_v2 = vadd.f32 %v733_v35, %v1607_v53  ;;  %v734_v37 = vmul.f32 %v1213_v13, %v1605_v51  ;;  %v1020_v35 = vld [vmem:[#allocation8 + $0x50] sm:$0xff]  ;;  %v246_v13 = vadd.f32 %v1676_v59, %v1590_v21  ;;  %v1015_v59 = vld [vmem:[#allocation8 + $0x28] sm:$0xff] }
 0x69d   :  { %737 = vrot.lane.b32.xlu0 %v735_v2, %s1351_s4  ;;  %v736_v41 = vadd.f32 %v734_v37, %v1611_v63  ;;  %v248_v37 = vadd.f32 %v1678_v61, %v1592_v23 }
 0x69f   :  { %739 = vrot.lane.b32.xlu1 %v736_v41, %s1351_s4  ;;  %v741_v39 = vmul.f32 %v736_v41, %v655_v25 }
 0x70f   :  { %v738_v43 = vpop.permute.xlu0 %737 }
 0x710   :  { %v742_v0 = vmul.f32 %v738_v43, %v735_v2 }
 0x711   :  { %v740_v7 = vpop.permute.xlu1 %739 }
 0x712   :  { %v743_v19 = vadd.f32 %v742_v0, %v741_v39  ;;  %v1019_v0 = vld [vmem:[#allocation8 + $0x48] sm:$0xff] }
 0x714   :  { %1214 = vtanh.f32 %v743_v19 }
 0x721   :  { %v1215_v27 = vpop.eup %1214 }
 0x722   :  { %v745_v29 = vmul.f32 %v1215_v27, %v740_v7  ;;  %v1017_v27 = vld [vmem:[#allocation8 + $0x38] sm:$0xff] }
 0x724   :  { %811 = vmatmul.mubr.f32.vlgmr.msra.gmra.mxu0 %v745_v29  ;;  %v1014_v29 = vld [vmem:[#allocation8 + $0x20] sm:$0xff] }
 0x725   :  { %923 = vmatpush1.msra.mxu0 %v1422_v4  ;;  %986 = vmatprep.mubr.f32.mxu0 %v1917_v15  ;;  %v234_v4 = vadd.f32 %v1668_v45, %v1590_v21 }
 0x726   :  { %924 = vmatprep.subr.mxu0 %v1424_v6 }
 0x727   :  { %925 = vmatpush1.msra.mxu0 %v1427_v8  ;;  %v236_v8 = vadd.f32 %v1670_v49, %v1592_v23 }
 0x728   :  { %926 = vmatprep.subr.mxu0 %v1430_v10 }
 0x729   :  { %927 = vmatpush1.msra.mxu0 %v1432_v12 }
 0x72a   :  { %928 = vmatprep.subr.mxu0 %v1435_v14 }
 0x72b   :  { %929 = vmatpush1.msra.mxu0 %v1438_v16 }
 0x72c   :  { %930 = vmatprep.subr.mxu0 %v1441_v18 }
 0x72d   :  { %931 = vmatpush1.msra.mxu0 %v1444_v20 }
 0x72e   :  { %932 = vmatprep.subr.mxu0 %v1447_v22 }
 0x72f   :  { %933 = vmatpush1.msra.mxu0 %v1450_v24 }
 0x730   :  { %934 = vmatprep.subr.mxu0 %v1453_v26 }
 0x731   :  { %935 = vmatpush1.msra.mxu0 %v1456_v28 }
 0x732   :  { %936 = vmatprep.subr.mxu0 %v1459_v30 }
 0x733   :  { %937 = vmatpush1.msra.mxu0 %v1462_v32 }
 0x734   :  { %938 = vmatprep.subr.mxu0 %v1465_v34 }
 0x735   :  { %939 = vmatpush1.msra.mxu0 %v1468_v36 }
 0x736   :  { %940 = vmatprep.subr.mxu0 %v1471_v38 }
 0x737   :  { %941 = vmatpush1.msra.mxu0 %v1474_v40 }
 0x738   :  { %942 = vmatprep.subr.mxu0 %v1477_v42  ;;  %v240_v42 = vadd.f32 %v1672_v55, %v1590_v21  ;;  %v1016_v21 = vld [vmem:[#allocation8 + $0x30] sm:$0xff] }
 0x739   :  { %943 = vmatpush1.msra.mxu0 %v1480_v44 }
 0x73a   :  { %944 = vmatprep.subr.mxu0 %v1483_v46  ;;  %v242_v46 = vadd.f32 %v1674_v57, %v1592_v23 }
 0x73b   :  { %945 = vmatpush1.msra.mxu0 %v1486_v48 }
 0x73c   :  { %946 = vmatprep.subr.mxu0 %v1489_v50 }
 0x73d   :  { %947 = vmatpush1.msra.mxu0 %v1492_v52 }
 0x73e   :  { %948 = vmatprep.subr.mxu0 %v1495_v54 }
 0x73f   :  { %949 = vmatpush1.msra.mxu0 %v1498_v56 }
 0x740   :  { %950 = vmatprep.subr.mxu0 %v1501_v58 }
 0x741   :  { %951 = vmatpush1.msra.mxu0 %v1504_v60 }
 0x742   :  { %952 = vmatprep.subr.mxu0 %v1507_v62 }
 0x743   :  { %953 = vmatpush1.msra.mxu0 %v1510_v1 }
 0x7e4   :  { %v812_v6 = vpop.f32.mrf.mxu0 }
 0x7e5   :  { %v817_v10 = vadd.f32 %v812_v6, %v234_v4 }
 0x7e6   :  { %v814_v12 = vpop.f32.mrf.mxu0 }
 0x7e7   :  { %1216 = vtanh.f32 %v817_v10  ;;  %v818_v14 = vadd.f32 %v814_v12, %v236_v8  ;;  %v1013_v8 = vld [vmem:[#allocation8 + $0x18] sm:$0xff] }
 0x7e9   :  { %1218 = vtanh.f32 %v818_v14 }
 0x7f4   :  { %v1217_v16 = vpop.eup %1216 }
 0x7f5   :  { %v821_v18 = vmul.f32 %v1217_v16, %v1603_v47 }
 0x7f6   :  { %v1219_v20 = vpop.eup %1218 }
 0x7f7   :  { %v823_v22 = vadd.f32 %v821_v18, %v1607_v53  ;;  %v822_v24 = vmul.f32 %v1219_v20, %v1605_v51 }
 0x7f9   :  { %825 = vrot.lane.b32.xlu0 %v823_v22, %s1351_s4  ;;  %v824_v26 = vadd.f32 %v822_v24, %v1611_v63  ;;  %v1121_v24 = vld [vmem:[%s1913_s7] ss:$0 sm:$0xff] }
 0x7fb   :  { %827 = vrot.lane.b32.xlu1 %v824_v26, %s1351_s4  ;;  %v829_v30 = vmul.f32 %v824_v26, %v743_v19  ;;  %v1018_v19 = vld [vmem:[#allocation8 + $0x40] sm:$0xff] }
 0x86b   :  { %v826_v28 = vpop.permute.xlu0 %825 }
 0x86c   :  { %v830_v32 = vmul.f32 %v826_v28, %v823_v22 }
 0x86d   :  { %v828_v38 = vpop.permute.xlu1 %827 }
 0x86e   :  { %v831_v34 = vadd.f32 %v830_v32, %v829_v30 }
 0x870   :  { %1220 = vtanh.f32 %v831_v34 }
 0x87d   :  { %v1221_v36 = vpop.eup %1220 }
 0x87e   :  { %v833_v40 = vmul.f32 %v1221_v36, %v828_v38 }
 0x880   :  { %899 = vmatmul.mubr.f32.vlgmr.msra.gmra.mxu1 %v833_v40 }
 0x881   :  { %1140 = vmatpush3.msra.mxu1 %v1025_v3  ;;  %1171 = vmatprep.mubr.msk.f32.mxu1 %vm1352_vm0, %v1917_v15 }
 0x882   :  { %1141 = vmatprep.subr.mxu1 %v1917_v15 }
 0x883   :  { %1142 = vmatpush3.msra.mxu1 %v1024_v5 }
 0x884   :  { %1143 = vmatprep.subr.mxu1 %v1917_v15 }
 0x885   :  { %1144 = vmatpush3.msra.mxu1 %v1023_v9 }
 0x886   :  { %1145 = vmatprep.subr.mxu1 %v1917_v15 }
 0x887   :  { %1146 = vmatpush3.msra.mxu1 %v1022_v11 }
 0x888   :  { %1147 = vmatprep.subr.mxu1 %v1917_v15 }
 0x889   :  { %1148 = vmatpush3.msra.mxu1 %v1021_v33 }
 0x88a   :  { %1149 = vmatprep.subr.mxu1 %v1917_v15 }
 0x88b   :  { %1150 = vmatpush3.msra.mxu1 %v1020_v35 }
 0x88c   :  { %1151 = vmatprep.subr.mxu1 %v1917_v15 }
 0x88d   :  { %1152 = vmatpush3.msra.mxu1 %v1019_v0 }
 0x88e   :  { %1153 = vmatprep.subr.mxu1 %v1917_v15 }
 0x88f   :  { %1154 = vmatpush3.msra.mxu1 %v1018_v19 }
 0x890   :  { %1155 = vmatprep.subr.mxu1 %v1917_v15 }
 0x891   :  { %1156 = vmatpush3.msra.mxu1 %v1017_v27 }
 0x892   :  { %1157 = vmatprep.subr.mxu1 %v1917_v15 }
 0x893   :  { %1158 = vmatpush3.msra.mxu1 %v1016_v21 }
 0x894   :  { %1159 = vmatprep.subr.mxu1 %v1917_v15 }
 0x895   :  { %1160 = vmatpush3.msra.mxu1 %v1015_v59 }
 0x896   :  { %1161 = vmatprep.subr.mxu1 %v1917_v15 }
 0x897   :  { %1162 = vmatpush3.msra.mxu1 %v1014_v29 }
 0x898   :  { %1163 = vmatprep.subr.mxu1 %v1917_v15 }
 0x899   :  { %1164 = vmatpush3.msra.mxu1 %v1013_v8 }
 0x89a   :  { %1165 = vmatprep.subr.mxu1 %v1917_v15 }
 0x940   :  { %v900_v44 = vpop.f32.mrf.mxu1 }
 0x941   :  { %v905_v48 = vadd.f32 %v900_v44, %v240_v42 }
 0x942   :  { %v902_v50 = vpop.f32.mrf.mxu1 }
 0x943   :  { %1222 = vtanh.f32 %v905_v48  ;;  %v906_v52 = vadd.f32 %v902_v50, %v242_v46 }
 0x945   :  { %1224 = vtanh.f32 %v906_v52 }
 0x950   :  { %v1223_v54 = vpop.eup %1222 }
 0x951   :  { %v909_v56 = vmul.f32 %v1223_v54, %v1603_v47 }
 0x952   :  { %v1225_v58 = vpop.eup %1224 }
 0x953   :  { %v911_v60 = vadd.f32 %v909_v56, %v1607_v53  ;;  %v910_v62 = vmul.f32 %v1225_v58, %v1605_v51 }
 0x955   :  { %913 = vrot.lane.b32.xlu0 %v911_v60, %s1351_s4  ;;  %v912_v1 = vadd.f32 %v910_v62, %v1611_v63 }
 0x957   :  { %915 = vrot.lane.b32.xlu1 %v912_v1, %s1351_s4  ;;  %v917_v49 = vmul.f32 %v912_v1, %v831_v34 }
 0x9c7   :  { %v914_v45 = vpop.permute.xlu0 %913 }
 0x9c8   :  { %v918_v55 = vmul.f32 %v914_v45, %v911_v60 }
 0x9c9   :  { %v916_v17 = vpop.permute.xlu1 %915 }
 0x9ca   :  { %v1870_v57 = vadd.f32 %v918_v55, %v917_v49 }
 0x9cc   :  { %1226 = vtanh.f32 %v1870_v57 }
 0x9d9   :  { %v1227_v25 = vpop.eup %1226 }
 0x9da   :  { %v921_v31 = vmul.f32 %v1227_v25, %v916_v17 }
 0x9dc   :  { %987 = vmatmul.mubr.f32.vlgmr.msra.gmra.mxu0 %v921_v31 }
 0xa9c   :  { %v988_v2 = vpop.f32.mrf.mxu0 }
 0xa9d   :  { %v993_v41 = vadd.f32 %v988_v2, %v246_v13 }
 0xa9e   :  { %v990_v43 = vpop.f32.mrf.mxu0 }
 0xa9f   :  { %1228 = vtanh.f32 %v993_v41  ;;  %v994_v39 = vadd.f32 %v990_v43, %v248_v37 }
 0xaa1   :  { %1230 = vtanh.f32 %v994_v39 }
 0xaac   :  { %v1229_v23 = vpop.eup %1228 }
 0xaad   :  { %v997_v61 = vmul.f32 %v1229_v23, %v1603_v47  ;;  %v1012_v47 = vld [vmem:[#allocation8 + $0x10] sm:$0xff] }
 0xaae   :  { %v1231_v7 = vpop.eup %1230  ;;  %1166 = vmatpush3.msra.mxu1 %v1012_v47 }
 0xaaf   :  { %v999_v4 = vadd.f32 %v997_v61, %v1607_v53  ;;  %v998_v6 = vmul.f32 %v1231_v7, %v1605_v51  ;;  %1167 = vmatprep.subr.mxu1 %v1917_v15  ;;  %v1011_v53 = vld [vmem:[#allocation8 + $0x8] sm:$0xff]  ;;  %v1010_v51 = vld [vmem:[#allocation8] sm:$0xff] }
 0xab0   :  { %1168 = vmatpush3.msra.mxu1 %v1011_v53 }
 0xab1   :  { %1001 = vrot.lane.b32.xlu0 %v999_v4, %s1351_s4  ;;  %v1000_v10 = vadd.f32 %v998_v6, %v1611_v63  ;;  %1169 = vmatprep.subr.mxu1 %v1917_v15 }
 0xab2   :  { %1170 = vmatpush3.msra.mxu1 %v1010_v51 }
 0xab3   :  { %1003 = vrot.lane.b32.xlu1 %v1000_v10, %s1351_s4  ;;  %v1005_v63 = vmul.f32 %v1000_v10, %v1870_v57 }
 0xb23   :  { %v1002_v12 = vpop.permute.xlu0 %1001 }
 0xb24   :  { %v1006_v14 = vmul.f32 %v1002_v12, %v999_v4 }
 0xb25   :  { %v1004_v20 = vpop.permute.xlu1 %1003 }
 0xb26   :  { %v1007_v16 = vadd.f32 %v1006_v14, %v1005_v63 }
 0xb28   :  { %1232 = vtanh.f32 %v1007_v16 }
 0xb35   :  { %v1233_v18 = vpop.eup %1232 }
 0xb36   :  { %v1009_v22 = vmul.f32 %v1233_v18, %v1004_v20 }
 0xb38   :  { %1172 = vmatmul.mubr.f32.vlgmr.msra.gmra.mxu1 %v1009_v22 }
 0xbf8   :  { %v1099_v26 = vpop.f32.mrf.mxu1 }
 0xbf9   :  { %v1100_v28 = vadd.f32 %v1121_v24, %v1099_v26 }
 0xbfa   :  { %v1173_v15 = vpop.f32.mrf.mxu1 }
 0xbfb   :  { %1103 = vst [vmem:[#allocation10] sm:$0xff] %v1100_v28 }
 0xbfc   :  { %1325 = shalt.err (!%p1322_p10)
}
 0xbfd   :  { %1113 = dma.vmem_to_hbm [thread:$0]  %s1111_s10, 128, %s1914_s8, [#allocation4]  }
 0xbfe   :  { %1340 = dma.done.wait [#allocation4], 128  }
 0xbff   :  { %1341 = vsyncadd [#allocation4], 4294967168 }
 0xc00   :  { %1117 = vsyncpa [#allocation3], 1 }
 0xc01   :  { %1118 = vsyncpa [#allocation6], 1 }
 0xc02   :  { %1119 = vsyncpa [#allocation9], 1 }
 0xc03   :  { %1120 = vsyncpa [#allocation4], 1 }

</bundles_post_ra>
